<compile_context>
chip_gen: v6e
topology: v6e:2x2x1
jax: 0.10.0
libtpu: 0.0.40
codegen_flags: <defaults>
</compile_context>

<pallas_src>
import functools

import jax
import jax.numpy as jnp
from jax import lax
from jax.experimental import pallas as pl
from jax.experimental.pallas import tpu as pltpu

VMEM_LIMIT_BYTES = 64 * 1024 * 1024  # explicit scoped-VMEM budget (fits v7x)


def _pick_tile(n, target, align):
    """Largest tile <= target that divides n and is a multiple of `align`;
    falls back to the full dimension when n is small or no divisor exists."""
    if n <= target:
        return n
    t = (target // align) * align
    while t >= align:
        if n % t == 0:
            return t
        t -= align
    return n


# ----------------------------------------------------------------------------
# Fused GEMM kernel:  (optional LN(x)) @ W  (+ bias) (-> GELU) (+ residual)
# ----------------------------------------------------------------------------
def _gemm_kernel(*refs, has_ln, has_bias, has_res, activation, eps):
    idx = 0
    x_ref = refs[idx]; idx += 1
    if has_ln:
        g_ref = refs[idx]; bln_ref = refs[idx + 1]; idx += 2
    w_ref = refs[idx]; idx += 1
    if has_bias:
        bias_ref = refs[idx]; idx += 1
    if has_res:
        res_ref = refs[idx]; idx += 1
    o_ref = refs[idx]; idx += 1
    acc_ref = refs[idx]

    k = pl.program_id(2)
    nk = pl.num_programs(2)

    @pl.when(k == 0)
    def _():
        acc_ref[...] = jnp.zeros_like(acc_ref)

    x = x_ref[...]
    if has_ln:
        # LN needs the full feature axis; wrapper guarantees tk == K here.
        xf = x.astype(jnp.float32)
        mu = jnp.mean(xf, axis=-1, keepdims=True)
        xc = xf - mu
        var = jnp.mean(xc * xc, axis=-1, keepdims=True)
        xn = xc * lax.rsqrt(var + eps)
        xn = xn * g_ref[...].astype(jnp.float32) + bln_ref[...].astype(jnp.float32)
        x = xn.astype(w_ref.dtype)  # bf16 into the MXU
    # bf16 x bf16 -> f32 accumulate (MXU fast path)
    acc_ref[...] += jnp.dot(x, w_ref[...], preferred_element_type=jnp.float32)

    @pl.when(k == nk - 1)
    def _():
        y = acc_ref[...]
        if has_bias:
            y = y + bias_ref[...].astype(jnp.float32)
        if activation == "gelu":
            # GPT-2 "gelu_new" (tanh approximation), computed in f32.
            y = 0.5 * y * (1.0 + jnp.tanh(
                0.7978845608028654 * (y + 0.044715 * y * y * y)))
        if has_res:
            y = y + res_ref[...].astype(jnp.float32)
        o_ref[...] = y.astype(o_ref.dtype)


def fused_matmul(x, w, *, bias=None, ln=None, residual=None, activation=None,
                 out_dtype=None, eps=1e-5, tm=256, tn=512, tk=512):
    """x: [M, K] bf16, w: [K, N] bf16 -> [M, N].

    Optional fusions: LayerNorm of x (ln=(gamma, beta), requires the full K in
    one tile), bias [N], tanh-GELU, residual add [M, N].
    """
    M, K = x.shape
    K2, N = w.shape
    assert K == K2
    out_dtype = out_dtype or x.dtype
    has_ln = ln is not None
    has_bias = bias is not None
    has_res = residual is not None

    tm = _pick_tile(M, tm, 8)
    tn = _pick_tile(N, tn, 128)
    tk = K if has_ln else _pick_tile(K, tk, 128)
    nk = K // tk
    grid = (M // tm, N // tn, nk)

    in_specs = [pl.BlockSpec((tm, tk), lambda i, j, k: (i, k))]
    inputs = [x]
    if has_ln:
        g, b_ln = ln
        in_specs += [pl.BlockSpec((1, K), lambda i, j, k: (0, 0)),
                     pl.BlockSpec((1, K), lambda i, j, k: (0, 0))]
        inputs += [g.reshape(1, K), b_ln.reshape(1, K)]
    in_specs.append(pl.BlockSpec((tk, tn), lambda i, j, k: (k, j)))
    inputs.append(w)
    if has_bias:
        in_specs.append(pl.BlockSpec((1, tn), lambda i, j, k: (0, j)))
        inputs.append(bias.reshape(1, N))
    if has_res:
        in_specs.append(pl.BlockSpec((tm, tn), lambda i, j, k: (i, j)))
        inputs.append(residual)

    kernel = functools.partial(_gemm_kernel, has_ln=has_ln, has_bias=has_bias,
                               has_res=has_res, activation=activation, eps=eps)
    return pl.pallas_call(
        kernel,
        out_shape=jax.ShapeDtypeStruct((M, N), out_dtype),
        grid=grid,
        in_specs=in_specs,
        out_specs=pl.BlockSpec((tm, tn), lambda i, j, k: (i, j)),
        scratch_shapes=[pltpu.VMEM((tm, tn), jnp.float32)],
        compiler_params=pltpu.CompilerParams(
            dimension_semantics=("parallel", "parallel", "arbitrary"),
            vmem_limit_bytes=VMEM_LIMIT_BYTES),
    )(*inputs)


# ----------------------------------------------------------------------------
# Flash-style causal attention (online softmax, causal tile skip)
# ----------------------------------------------------------------------------
def _flash_attn_kernel(q_ref, k_ref, v_ref, o_ref, m_sc, l_sc, acc_sc,
                       *, scale, tq, tk):
    qi = pl.program_id(1)
    ki = pl.program_id(2)

    @pl.when(ki == 0)
    def _():
        m_sc[...] = jnp.full_like(m_sc, -jnp.inf)
        l_sc[...] = jnp.zeros_like(l_sc)
        acc_sc[...] = jnp.zeros_like(acc_sc)

    # Skip KV tiles that lie entirely above the causal diagonal.
    @pl.when(ki * tk <= qi * tq + (tq - 1))
    def _():
        q = q_ref[0]  # [tq, Dh] bf16
        k = k_ref[0]  # [tk, Dh] bf16
        # Contract Dh directly (no explicit transpose of K).
        s = lax.dot_general(q, k, (((1,), (1,)), ((), ())),
                            preferred_element_type=jnp.float32) * scale
        row = qi * tq + lax.broadcasted_iota(jnp.int32, (tq, tk), 0)
        col = ki * tk + lax.broadcasted_iota(jnp.int32, (tq, tk), 1)
        s = jnp.where(col <= row, s, jnp.float32(-1e30))
        m_prev = m_sc[...]
        m_new = jnp.maximum(m_prev, s.max(axis=-1, keepdims=True))
        alpha = jnp.exp(m_prev - m_new)
        p = jnp.exp(s - m_new)
        l_sc[...] = alpha * l_sc[...] + p.sum(axis=-1, keepdims=True)
        acc_sc[...] = alpha * acc_sc[...] + jnp.dot(
            p.astype(v_ref.dtype), v_ref[0], preferred_element_type=jnp.float32)
        m_sc[...] = m_new

    @pl.when(ki == pl.num_programs(2) - 1)
    def _():
        inv_l = pl.reciprocal(l_sc[...], approx=True)
        o_ref[0] = (acc_sc[...] * inv_l).astype(o_ref.dtype)


def causal_attention(q, k, v, scale, *, tq=256, tk=256):
    """q, k, v: [BH, T, Dh] bf16 -> [BH, T, Dh] bf16."""
    BH, T, Dh = q.shape
    tq = _pick_tile(T, tq, 8)
    tk = _pick_tile(T, tk, 8)
    grid = (BH, T // tq, T // tk)

    q_spec = pl.BlockSpec((1, tq, Dh), lambda b, i, j: (b, i, 0))
    kv_spec = pl.BlockSpec((1, tk, Dh), lambda b, i, j: (b, j, 0))
    out_spec = pl.BlockSpec((1, tq, Dh), lambda b, i, j: (b, i, 0))

    kernel = functools.partial(_flash_attn_kernel, scale=scale, tq=tq, tk=tk)
    return pl.pallas_call(
        kernel,
        out_shape=jax.ShapeDtypeStruct((BH, T, Dh), q.dtype),
        grid=grid,
        in_specs=[q_spec, kv_spec, kv_spec],
        out_specs=out_spec,
        scratch_shapes=[pltpu.VMEM((tq, 1), jnp.float32),
                        pltpu.VMEM((tq, 1), jnp.float32),
                        pltpu.VMEM((tq, Dh), jnp.float32)],
        compiler_params=pltpu.CompilerParams(
            dimension_semantics=("parallel", "parallel", "arbitrary"),
            vmem_limit_bytes=VMEM_LIMIT_BYTES),
    )(q, k, v)


# ----------------------------------------------------------------------------
# Model: deterministic parameter init + forward pass (glue in plain JAX)
# ----------------------------------------------------------------------------
def init_params(key, *, vocab, max_t, d, n_layer, n_head, d_ff):
    std = 0.02
    keys = jax.random.split(key, 2 + n_layer)
    wte = (std * jax.random.normal(keys[0], (vocab, d), jnp.float32)).astype(jnp.bfloat16)
    wpe = (std * jax.random.normal(keys[1], (max_t, d), jnp.float32)).astype(jnp.bfloat16)
    params = {
        "wte": wte,
        "wte_T": wte.T,  # tied LM head, pre-materialized once
        "wpe": wpe,
        "lnf_g": jnp.ones((d,), jnp.float32),
        "lnf_b": jnp.zeros((d,), jnp.float32),
        "blocks": [],
    }
    for l in range(n_layer):
        bk = jax.random.split(keys[2 + l], 4)
        params["blocks"].append({
            "ln1_g": jnp.ones((d,), jnp.float32),
            "ln1_b": jnp.zeros((d,), jnp.float32),
            "w_qkv": (std * jax.random.normal(bk[0], (d, 3 * d), jnp.float32)).astype(jnp.bfloat16),
            "b_qkv": jnp.zeros((3 * d,), jnp.float32),
            "w_o": (std * jax.random.normal(bk[1], (d, d), jnp.float32)).astype(jnp.bfloat16),
            "b_o": jnp.zeros((d,), jnp.float32),
            "ln2_g": jnp.ones((d,), jnp.float32),
            "ln2_b": jnp.zeros((d,), jnp.float32),
            "w_fc1": (std * jax.random.normal(bk[2], (d, d_ff), jnp.float32)).astype(jnp.bfloat16),
            "b_fc1": jnp.zeros((d_ff,), jnp.float32),
            "w_fc2": (std * jax.random.normal(bk[3], (d_ff, d), jnp.float32)).astype(jnp.bfloat16),
            "b_fc2": jnp.zeros((d,), jnp.float32),
        })
    return params


def gpt_forward(params, tokens, *, n_head):
    B, T = tokens.shape
    V, D = params["wte"].shape
    Dh = D // n_head
    scale = 1.0 / (Dh ** 0.5)

    # glue: embedding gather + positional embedding (not the hot path)
    h = params["wte"][tokens] + params["wpe"][:T][None, :, :]   # [B, T, D] bf16
    h = h.reshape(B * T, D)

    def to_heads(t):
        return t.reshape(B, T, n_head, Dh).transpose(0, 2, 1, 3).reshape(B * n_head, T, Dh)

    def from_heads(t):
        return t.reshape(B, n_head, T, Dh).transpose(0, 2, 1, 3).reshape(B * T, D)

    for blk in params["blocks"]:
        # --- attention sub-block: fused LN1 + QKV projection ---
        qkv = fused_matmul(h, blk["w_qkv"], bias=blk["b_qkv"],
                           ln=(blk["ln1_g"], blk["ln1_b"]))        # [BT, 3D]
        q, k, v = jnp.split(qkv, 3, axis=-1)
        attn = causal_attention(to_heads(q), to_heads(k), to_heads(v), scale)
        # output projection + residual add, fused in one kernel
        h = fused_matmul(from_heads(attn), blk["w_o"], bias=blk["b_o"],
                         residual=h)
        # --- MLP sub-block: fused LN2 + fc1 + GELU, then fc2 + residual ---
        m = fused_matmul(h, blk["w_fc1"], bias=blk["b_fc1"],
                         ln=(blk["ln2_g"], blk["ln2_b"]), activation="gelu")
        h = fused_matmul(m, blk["w_fc2"], bias=blk["b_fc2"], residual=h)

    # fused final LN + tied LM head (no bias), vocab axis tiled, logits in f32
    logits = fused_matmul(h, params["wte_T"],
                          ln=(params["lnf_g"], params["lnf_b"]),
                          out_dtype=jnp.float32)                    # [BT, V]
    return logits.reshape(B, T, V)


# TODO(synk): the PyTorch module also exposes get_loss (cross-entropy over
# shifted labels via HF `.loss`); only the forward (logits) path is here.
# TODO(synk): HF model/tokenizer loading & dropout-reset config plumbing have
# no kernel equivalent; a deterministic GPT-2-style model is built in-script.

if __name__ == "__main__":
    B, T = 2, 8
    VOCAB, MAX_T, D, N_LAYER, N_HEAD, D_FF = 128, 16, 32, 2, 4, 128

    key = jax.random.PRNGKey(0)
    pkey, tkey = jax.random.split(key)
    params = init_params(pkey, vocab=VOCAB, max_t=MAX_T, d=D,
                         n_layer=N_LAYER, n_head=N_HEAD, d_ff=D_FF)
    tokens = jax.random.randint(tkey, (B, T), 0, VOCAB, dtype=jnp.int32)

    fwd = jax.jit(functools.partial(gpt_forward, n_head=N_HEAD))
    logits = fwd(params, tokens)
    logits = jax.block_until_ready(logits)

    assert logits.shape == (B, T, VOCAB), logits.shape
    assert jnp.all(jnp.isfinite(logits))
    print("KERNEL_OK")
</pallas_src>

<mosaic_0001>
module attributes {stable_mosaic.version = 11 : i64} {
  func.func @_gemm_kernel(%arg0: i32, %arg1: i32, %arg2: i32, %arg3: memref<16x32xbf16, #tpu.memory_space<vmem>>, %arg4: memref<1x32xf32, #tpu.memory_space<vmem>>, %arg5: memref<1x32xf32, #tpu.memory_space<vmem>>, %arg6: memref<32x96xbf16, #tpu.memory_space<vmem>>, %arg7: memref<1x96xf32, #tpu.memory_space<vmem>>, %arg8: memref<16x96xbf16, #tpu.memory_space<vmem>>, %arg9: memref<16x96xf32, #tpu.memory_space<vmem>>) attributes {dimension_semantics = [#tpu.dimension_semantics<parallel>, #tpu.dimension_semantics<parallel>, #tpu.dimension_semantics<arbitrary>], iteration_bounds = array<i64: 1, 1, 1>, scalar_prefetch = 0 : i64, scratch_operands = 1 : i64, tpu.core_type = #tpu.core_type<tc>, window_params = [{transform_indices = @transform_0, window_bounds = array<i64: 16, 32>}, {pipeline_mode = #tpu.pipeline_mode<synchronous>, transform_indices = @transform_1, window_bounds = array<i64: 1, 32>}, {pipeline_mode = #tpu.pipeline_mode<synchronous>, transform_indices = @transform_2, window_bounds = array<i64: 1, 32>}, {transform_indices = @transform_3, window_bounds = array<i64: 32, 96>}, {transform_indices = @transform_4, window_bounds = array<i64: 1, 96>}, {transform_indices = @transform_5, window_bounds = array<i64: 16, 96>}]} {
    %c0_i32 = arith.constant 0 : i32
    %0 = arith.cmpi eq, %arg2, %c0_i32 : i32
    %1 = arith.extui %0 : i1 to i32
    %c0_i32_0 = arith.constant 0 : i32
    %2 = arith.cmpi ne, %1, %c0_i32_0 : i32
    scf.if %2 {
      %cst_19 = arith.constant 0.000000e+00 : f32
      %36 = vector.broadcast %cst_19 : f32 to vector<16x96xf32>
      %c0_20 = arith.constant 0 : index
      %c0_21 = arith.constant 0 : index
      %37 = vector.load %arg9[%c0_20, %c0_21] : memref<16x96xf32, #tpu.memory_space<vmem>>, vector<16x96xf32>
      tpu.vector_store %arg9[%c0_20, %c0_21], %36 {strides = array<i32>} : memref<16x96xf32, #tpu.memory_space<vmem>>, vector<16x96xf32>,
    } else {
    }
    %c0 = arith.constant 0 : index
    %c0_1 = arith.constant 0 : index
    %3 = vector.load %arg3[%c0, %c0_1] : memref<16x32xbf16, #tpu.memory_space<vmem>>, vector<16x32xbf16>
    %4 = arith.extf %3 : vector<16x32xbf16> to vector<16x32xf32>
    %cst = arith.constant dense<0.000000e+00> : vector<16xf32>
    %5 = vector.multi_reduction <add>, %4, %cst [1] : vector<16x32xf32> to vector<16xf32>
    %6 = vector.shape_cast %5 : vector<16xf32> to vector<16x1xf32>
    %cst_2 = arith.constant 3.200000e+01 : f32
    %7 = vector.broadcast %cst_2 : f32 to vector<16x1xf32>
    %8 = arith.divf %6, %7 : vector<16x1xf32>
    %9 = vector.broadcast %8 : vector<16x1xf32> to vector<16x32xf32>
    %10 = arith.subf %4, %9 : vector<16x32xf32>
    %11 = arith.mulf %10, %10 : vector<16x32xf32>
    %cst_3 = arith.constant dense<0.000000e+00> : vector<16xf32>
    %12 = vector.multi_reduction <add>, %11, %cst_3 [1] : vector<16x32xf32> to vector<16xf32>
    %13 = vector.shape_cast %12 : vector<16xf32> to vector<16x1xf32>
    %cst_4 = arith.constant 3.200000e+01 : f32
    %14 = vector.broadcast %cst_4 : f32 to vector<16x1xf32>
    %15 = arith.divf %13, %14 : vector<16x1xf32>
    %cst_5 = arith.constant 9.99999974E-6 : f32
    %16 = vector.broadcast %cst_5 : f32 to vector<16x1xf32>
    %17 = arith.addf %15, %16 : vector<16x1xf32>
    %18 = math.rsqrt %17 : vector<16x1xf32>
    %19 = vector.broadcast %18 : vector<16x1xf32> to vector<16x32xf32>
    %20 = arith.mulf %10, %19 : vector<16x32xf32>
    %c0_6 = arith.constant 0 : index
    %c0_7 = arith.constant 0 : index
    %21 = vector.load %arg4[%c0_6, %c0_7] : memref<1x32xf32, #tpu.memory_space<vmem>>, vector<1x32xf32>
    %22 = vector.broadcast %21 : vector<1x32xf32> to vector<16x32xf32>
    %23 = arith.mulf %20, %22 : vector<16x32xf32>
    %c0_8 = arith.constant 0 : index
    %c0_9 = arith.constant 0 : index
    %24 = vector.load %arg5[%c0_8, %c0_9] : memref<1x32xf32, #tpu.memory_space<vmem>>, vector<1x32xf32>
    %25 = vector.broadcast %24 : vector<1x32xf32> to vector<16x32xf32>
    %26 = arith.addf %23, %25 : vector<16x32xf32>
    %27 = arith.truncf %26 : vector<16x32xf32> to vector<16x32xbf16>
    %c0_10 = arith.constant 0 : index
    %c0_11 = arith.constant 0 : index
    %28 = vector.load %arg9[%c0_10, %c0_11] : memref<16x96xf32, #tpu.memory_space<vmem>>, vector<16x96xf32>
    %c0_12 = arith.constant 0 : index
    %c0_13 = arith.constant 0 : index
    %29 = vector.load %arg6[%c0_12, %c0_13] : memref<32x96xbf16, #tpu.memory_space<vmem>>, vector<32x96xbf16>
    %cst_14 = arith.constant dense<0.000000e+00> : vector<16x96xf32>
    %30 = tpu.matmul %27, %29, %cst_14 {dimension_numbers = #tpu.dot_dimension_numbers<[1], [0], [0], [1], [0, 0, 1, 1], [], []>} : vector<16x32xbf16>, vector<32x96xbf16>, vector<16x96xf32> -> vector<16x96xf32>
    %31 = arith.addf %28, %30 : vector<16x96xf32>
    %c0_15 = arith.constant 0 : index
    %c0_16 = arith.constant 0 : index
    %32 = vector.load %arg9[%c0_15, %c0_16] : memref<16x96xf32, #tpu.memory_space<vmem>>, vector<16x96xf32>
    tpu.vector_store %arg9[%c0_15, %c0_16], %31 {strides = array<i32>} : memref<16x96xf32, #tpu.memory_space<vmem>>, vector<16x96xf32>,
    %c0_i32_17 = arith.constant 0 : i32
    %33 = arith.cmpi eq, %arg2, %c0_i32_17 : i32
    %34 = arith.extui %33 : i1 to i32
    %c0_i32_18 = arith.constant 0 : i32
    %35 = arith.cmpi ne, %34, %c0_i32_18 : i32
    scf.if %35 {
      %c0_19 = arith.constant 0 : index
      %c0_20 = arith.constant 0 : index
      %36 = vector.load %arg9[%c0_19, %c0_20] : memref<16x96xf32, #tpu.memory_space<vmem>>, vector<16x96xf32>
      %c0_21 = arith.constant 0 : index
      %c0_22 = arith.constant 0 : index
      %37 = vector.load %arg7[%c0_21, %c0_22] : memref<1x96xf32, #tpu.memory_space<vmem>>, vector<1x96xf32>
      %38 = vector.broadcast %37 : vector<1x96xf32> to vector<16x96xf32>
      %39 = arith.addf %36, %38 : vector<16x96xf32>
      %40 = arith.truncf %39 : vector<16x96xf32> to vector<16x96xbf16>
      %c0_23 = arith.constant 0 : index
      %c0_24 = arith.constant 0 : index
      %41 = vector.load %arg8[%c0_23, %c0_24] : memref<16x96xbf16, #tpu.memory_space<vmem>>, vector<16x96xbf16>
      tpu.vector_store %arg8[%c0_23, %c0_24], %40 {strides = array<i32>} : memref<16x96xbf16, #tpu.memory_space<vmem>>, vector<16x96xbf16>,
    } else {
    }
    return
  }
  func.func @transform_0(%arg0: i32, %arg1: i32, %arg2: i32) -> (i32, i32) {
    %c0_i32 = arith.constant 0 : i32
    return %arg0, %arg2 : i32, i32
  }
  func.func @transform_1(%arg0: i32, %arg1: i32, %arg2: i32) -> (i32, i32) {
    %c0_i32 = arith.constant 0 : i32
    %c0_i32_0 = arith.constant 0 : i32
    %c0_i32_1 = arith.constant 0 : i32
    return %c0_i32, %c0_i32_0 : i32, i32
  }
  func.func @transform_2(%arg0: i32, %arg1: i32, %arg2: i32) -> (i32, i32) {
    %c0_i32 = arith.constant 0 : i32
    %c0_i32_0 = arith.constant 0 : i32
    %c0_i32_1 = arith.constant 0 : i32
    return %c0_i32, %c0_i32_0 : i32, i32
  }
  func.func @transform_3(%arg0: i32, %arg1: i32, %arg2: i32) -> (i32, i32) {
    %c0_i32 = arith.constant 0 : i32
    return %arg2, %arg1 : i32, i32
  }
  func.func @transform_4(%arg0: i32, %arg1: i32, %arg2: i32) -> (i32, i32) {
    %c0_i32 = arith.constant 0 : i32
    %c0_i32_0 = arith.constant 0 : i32
    return %c0_i32, %arg1 : i32, i32
  }
  func.func @transform_5(%arg0: i32, %arg1: i32, %arg2: i32) -> (i32, i32) {
    %c0_i32 = arith.constant 0 : i32
    return %arg0, %arg1 : i32, i32
  }
}

module attributes {stable_mosaic.version = 11 : i64} {
  func.func @_flash_attn_kernel(%arg0: i32, %arg1: i32, %arg2: i32, %arg3: memref<1x8x8xbf16, #tpu.memory_space<vmem>>, %arg4: memref<1x8x8xbf16, #tpu.memory_space<vmem>>, %arg5: memref<1x8x8xbf16, #tpu.memory_space<vmem>>, %arg6: memref<1x8x8xbf16, #tpu.memory_space<vmem>>, %arg7: memref<8x1xf32, #tpu.memory_space<vmem>>, %arg8: memref<8x1xf32, #tpu.memory_space<vmem>>, %arg9: memref<8x8xf32, #tpu.memory_space<vmem>>) attributes {dimension_semantics = [#tpu.dimension_semantics<parallel>, #tpu.dimension_semantics<parallel>, #tpu.dimension_semantics<arbitrary>], iteration_bounds = array<i64: 8, 1, 1>, scalar_prefetch = 0 : i64, scratch_operands = 3 : i64, tpu.core_type = #tpu.core_type<tc>, window_params = [{transform_indices = @transform_0, window_bounds = array<i64: 1, 8, 8>}, {transform_indices = @transform_1, window_bounds = array<i64: 1, 8, 8>}, {transform_indices = @transform_2, window_bounds = array<i64: 1, 8, 8>}, {transform_indices = @transform_3, window_bounds = array<i64: 1, 8, 8>}]} {
    %c0_i32 = arith.constant 0 : i32
    %0 = arith.cmpi eq, %arg2, %c0_i32 : i32
    %1 = arith.extui %0 : i1 to i32
    %c0_i32_0 = arith.constant 0 : i32
    %2 = arith.cmpi ne, %1, %c0_i32_0 : i32
    scf.if %2 {
      %cst = arith.constant 0xFF800000 : f32
      %12 = vector.broadcast %cst : f32 to vector<8x1xf32>
      %c0 = arith.constant 0 : index
      %c0_5 = arith.constant 0 : index
      %13 = vector.load %arg7[%c0, %c0_5] : memref<8x1xf32, #tpu.memory_space<vmem>>, vector<8x1xf32>
      tpu.vector_store %arg7[%c0, %c0_5], %12 {strides = array<i32>} : memref<8x1xf32, #tpu.memory_space<vmem>>, vector<8x1xf32>,
      %cst_6 = arith.constant 0.000000e+00 : f32
      %14 = vector.broadcast %cst_6 : f32 to vector<8x1xf32>
      %c0_7 = arith.constant 0 : index
      %c0_8 = arith.constant 0 : index
      %15 = vector.load %arg8[%c0_7, %c0_8] : memref<8x1xf32, #tpu.memory_space<vmem>>, vector<8x1xf32>
      tpu.vector_store %arg8[%c0_7, %c0_8], %14 {strides = array<i32>} : memref<8x1xf32, #tpu.memory_space<vmem>>, vector<8x1xf32>,
      %cst_9 = arith.constant 0.000000e+00 : f32
      %16 = vector.broadcast %cst_9 : f32 to vector<8x8xf32>
      %c0_10 = arith.constant 0 : index
      %c0_11 = arith.constant 0 : index
      %17 = vector.load %arg9[%c0_10, %c0_11] : memref<8x8xf32, #tpu.memory_space<vmem>>, vector<8x8xf32>
      tpu.vector_store %arg9[%c0_10, %c0_11], %16 {strides = array<i32>} : memref<8x8xf32, #tpu.memory_space<vmem>>, vector<8x8xf32>,
    } else {
    }
    %c8_i32 = arith.constant 8 : i32
    %3 = arith.muli %arg2, %c8_i32 : i32
    %c8_i32_1 = arith.constant 8 : i32
    %4 = arith.muli %arg1, %c8_i32_1 : i32
    %c7_i32 = arith.constant 7 : i32
    %5 = arith.addi %4, %c7_i32 : i32
    %6 = arith.cmpi sle, %3, %5 : i32
    %7 = arith.extui %6 : i1 to i32
    %c0_i32_2 = arith.constant 0 : i32
    %8 = arith.cmpi ne, %7, %c0_i32_2 : i32
    scf.if %8 {
      %c0 = arith.constant 0 : index
      %c0_5 = arith.constant 0 : index
      %c0_6 = arith.constant 0 : index
      %12 = vector.load %arg3[%c0, %c0_5, %c0_6] : memref<1x8x8xbf16, #tpu.memory_space<vmem>>, vector<1x8x8xbf16>
      %13 = vector.shape_cast %12 : vector<1x8x8xbf16> to vector<8x8xbf16>
      %c0_7 = arith.constant 0 : index
      %c0_8 = arith.constant 0 : index
      %c0_9 = arith.constant 0 : index
      %14 = vector.load %arg4[%c0_7, %c0_8, %c0_9] : memref<1x8x8xbf16, #tpu.memory_space<vmem>>, vector<1x8x8xbf16>
      %15 = vector.shape_cast %14 : vector<1x8x8xbf16> to vector<8x8xbf16>
      %cst = arith.constant dense<0.000000e+00> : vector<8x8xf32>
      %16 = tpu.matmul %13, %15, %cst {dimension_numbers = #tpu.dot_dimension_numbers<[1], [1], [0], [0], [0, 0, 1, 0], [], []>} : vector<8x8xbf16>, vector<8x8xbf16>, vector<8x8xf32> -> vector<8x8xf32>
      %cst_10 = arith.constant 0.353553385 : f32
      %17 = vector.broadcast %cst_10 : f32 to vector<8x8xf32>
      %18 = arith.mulf %16, %17 : vector<8x8xf32>
      %c8_i32_11 = arith.constant 8 : i32
      %19 = arith.muli %arg1, %c8_i32_11 : i32
      %20 = tpu.iota {dimensions = array<i32: 0>} : vector<8x8xi32>
      %21 = vector.broadcast %19 : i32 to vector<8x8xi32>
      %22 = arith.addi %21, %20 : vector<8x8xi32>
      %c8_i32_12 = arith.constant 8 : i32
      %23 = arith.muli %arg2, %c8_i32_12 : i32
      %24 = tpu.iota {dimensions = array<i32: 1>} : vector<8x8xi32>
      %25 = vector.broadcast %23 : i32 to vector<8x8xi32>
      %26 = arith.addi %25, %24 : vector<8x8xi32>
      %27 = arith.cmpi sle, %26, %22 : vector<8x8xi32>
      %cst_13 = arith.constant -1.000000e+30 : f32
      %28 = vector.broadcast %cst_13 : f32 to vector<8x8xf32>
      %29 = arith.select %27, %18, %28 : vector<8x8xi1>, vector<8x8xf32>
      %c0_14 = arith.constant 0 : index
      %c0_15 = arith.constant 0 : index
      %30 = vector.load %arg7[%c0_14, %c0_15] : memref<8x1xf32, #tpu.memory_space<vmem>>, vector<8x1xf32>
      %cst_16 = arith.constant dense<0xFF800000> : vector<8xf32>
      %31 = vector.multi_reduction <maximumf>, %29, %cst_16 [1] : vector<8x8xf32> to vector<8xf32>
      %32 = vector.shape_cast %31 : vector<8xf32> to vector<8x1xf32>
      %33 = arith.maximumf %30, %32 : vector<8x1xf32>
      %34 = arith.subf %30, %33 : vector<8x1xf32>
      %35 = math.exp %34 : vector<8x1xf32>
      %36 = vector.broadcast %33 : vector<8x1xf32> to vector<8x8xf32>
      %37 = arith.subf %29, %36 : vector<8x8xf32>
      %38 = math.exp %37 : vector<8x8xf32>
      %c0_17 = arith.constant 0 : index
      %c0_18 = arith.constant 0 : index
      %39 = vector.load %arg8[%c0_17, %c0_18] : memref<8x1xf32, #tpu.memory_space<vmem>>, vector<8x1xf32>
      %40 = arith.mulf %35, %39 : vector<8x1xf32>
      %cst_19 = arith.constant dense<0.000000e+00> : vector<8xf32>
      %41 = vector.multi_reduction <add>, %38, %cst_19 [1] : vector<8x8xf32> to vector<8xf32>
      %42 = vector.shape_cast %41 : vector<8xf32> to vector<8x1xf32>
      %43 = arith.addf %40, %42 : vector<8x1xf32>
      %c0_20 = arith.constant 0 : index
      %c0_21 = arith.constant 0 : index
      %44 = vector.load %arg8[%c0_20, %c0_21] : memref<8x1xf32, #tpu.memory_space<vmem>>, vector<8x1xf32>
      tpu.vector_store %arg8[%c0_20, %c0_21], %43 {strides = array<i32>} : memref<8x1xf32, #tpu.memory_space<vmem>>, vector<8x1xf32>,
      %c0_22 = arith.constant 0 : index
      %c0_23 = arith.constant 0 : index
      %45 = vector.load %arg9[%c0_22, %c0_23] : memref<8x8xf32, #tpu.memory_space<vmem>>, vector<8x8xf32>
      %46 = vector.broadcast %35 : vector<8x1xf32> to vector<8x8xf32>
      %47 = arith.mulf %46, %45 : vector<8x8xf32>
      %48 = arith.truncf %38 : vector<8x8xf32> to vector<8x8xbf16>
      %c0_24 = arith.constant 0 : index
      %c0_25 = arith.constant 0 : index
      %c0_26 = arith.constant 0 : index
      %49 = vector.load %arg5[%c0_24, %c0_25, %c0_26] : memref<1x8x8xbf16, #tpu.memory_space<vmem>>, vector<1x8x8xbf16>
      %50 = vector.shape_cast %49 : vector<1x8x8xbf16> to vector<8x8xbf16>
      %cst_27 = arith.constant dense<0.000000e+00> : vector<8x8xf32>
      %51 = tpu.matmul %48, %50, %cst_27 {dimension_numbers = #tpu.dot_dimension_numbers<[1], [0], [0], [1], [0, 0, 1, 1], [], []>} : vector<8x8xbf16>, vector<8x8xbf16>, vector<8x8xf32> -> vector<8x8xf32>
      %52 = arith.addf %47, %51 : vector<8x8xf32>
      %c0_28 = arith.constant 0 : index
      %c0_29 = arith.constant 0 : index
      %53 = vector.load %arg9[%c0_28, %c0_29] : memref<8x8xf32, #tpu.memory_space<vmem>>, vector<8x8xf32>
      tpu.vector_store %arg9[%c0_28, %c0_29], %52 {strides = array<i32>} : memref<8x8xf32, #tpu.memory_space<vmem>>, vector<8x8xf32>,
      %c0_30 = arith.constant 0 : index
      %c0_31 = arith.constant 0 : index
      %54 = vector.load %arg7[%c0_30, %c0_31] : memref<8x1xf32, #tpu.memory_space<vmem>>, vector<8x1xf32>
      tpu.vector_store %arg7[%c0_30, %c0_31], %33 {strides = array<i32>} : memref<8x1xf32, #tpu.memory_space<vmem>>, vector<8x1xf32>,
    } else {
    }
    %c0_i32_3 = arith.constant 0 : i32
    %9 = arith.cmpi eq, %arg2, %c0_i32_3 : i32
    %10 = arith.extui %9 : i1 to i32
    %c0_i32_4 = arith.constant 0 : i32
    %11 = arith.cmpi ne, %10, %c0_i32_4 : i32
    scf.if %11 {
      %c0 = arith.constant 0 : index
      %c0_5 = arith.constant 0 : index
      %12 = vector.load %arg8[%c0, %c0_5] : memref<8x1xf32, #tpu.memory_space<vmem>>, vector<8x1xf32>
      %13 = tpu.reciprocal %12 {approx = true} : vector<8x1xf32> -> vector<8x1xf32>
      %c0_6 = arith.constant 0 : index
      %c0_7 = arith.constant 0 : index
      %14 = vector.load %arg9[%c0_6, %c0_7] : memref<8x8xf32, #tpu.memory_space<vmem>>, vector<8x8xf32>
      %15 = vector.broadcast %13 : vector<8x1xf32> to vector<8x8xf32>
      %16 = arith.mulf %14, %15 : vector<8x8xf32>
      %17 = arith.truncf %16 : vector<8x8xf32> to vector<8x8xbf16>
      %c0_8 = arith.constant 0 : index
      %c0_9 = arith.constant 0 : index
      %c0_10 = arith.constant 0 : index
      %18 = vector.load %arg6[%c0_8, %c0_9, %c0_10] : memref<1x8x8xbf16, #tpu.memory_space<vmem>>, vector<1x8x8xbf16>
      %19 = vector.shape_cast %18 : vector<1x8x8xbf16> to vector<8x8xbf16>
      %20 = vector.shape_cast %17 : vector<8x8xbf16> to vector<1x8x8xbf16>
      tpu.vector_store %arg6[%c0_8, %c0_9, %c0_10], %20 {strides = array<i32>} : memref<1x8x8xbf16, #tpu.memory_space<vmem>>, vector<1x8x8xbf16>,
    } else {
    }
    return
  }
  func.func @transform_0(%arg0: i32, %arg1: i32, %arg2: i32) -> (i32, i32, i32) {
    %c0_i32 = arith.constant 0 : i32
    %c0_i32_0 = arith.constant 0 : i32
    return %arg0, %arg1, %c0_i32 : i32, i32, i32
  }
  func.func @transform_1(%arg0: i32, %arg1: i32, %arg2: i32) -> (i32, i32, i32) {
    %c0_i32 = arith.constant 0 : i32
    %c0_i32_0 = arith.constant 0 : i32
    return %arg0, %arg2, %c0_i32 : i32, i32, i32
  }
  func.func @transform_2(%arg0: i32, %arg1: i32, %arg2: i32) -> (i32, i32, i32) {
    %c0_i32 = arith.constant 0 : i32
    %c0_i32_0 = arith.constant 0 : i32
    return %arg0, %arg2, %c0_i32 : i32, i32, i32
  }
  func.func @transform_3(%arg0: i32, %arg1: i32, %arg2: i32) -> (i32, i32, i32) {
    %c0_i32 = arith.constant 0 : i32
    %c0_i32_0 = arith.constant 0 : i32
    return %arg0, %arg1, %c0_i32 : i32, i32, i32
  }
}

module attributes {stable_mosaic.version = 11 : i64} {
  func.func @_gemm_kernel(%arg0: i32, %arg1: i32, %arg2: i32, %arg3: memref<16x32xbf16, #tpu.memory_space<vmem>>, %arg4: memref<32x32xbf16, #tpu.memory_space<vmem>>, %arg5: memref<1x32xf32, #tpu.memory_space<vmem>>, %arg6: memref<16x32xbf16, #tpu.memory_space<vmem>>, %arg7: memref<16x32xbf16, #tpu.memory_space<vmem>>, %arg8: memref<16x32xf32, #tpu.memory_space<vmem>>) attributes {dimension_semantics = [#tpu.dimension_semantics<parallel>, #tpu.dimension_semantics<parallel>, #tpu.dimension_semantics<arbitrary>], iteration_bounds = array<i64: 1, 1, 1>, scalar_prefetch = 0 : i64, scratch_operands = 1 : i64, tpu.core_type = #tpu.core_type<tc>, window_params = [{transform_indices = @transform_0, window_bounds = array<i64: 16, 32>}, {transform_indices = @transform_1, window_bounds = array<i64: 32, 32>}, {transform_indices = @transform_2, window_bounds = array<i64: 1, 32>}, {transform_indices = @transform_3, window_bounds = array<i64: 16, 32>}, {transform_indices = @transform_4, window_bounds = array<i64: 16, 32>}]} {
    %c0_i32 = arith.constant 0 : i32
    %0 = arith.cmpi eq, %arg2, %c0_i32 : i32
    %1 = arith.extui %0 : i1 to i32
    %c0_i32_0 = arith.constant 0 : i32
    %2 = arith.cmpi ne, %1, %c0_i32_0 : i32
    scf.if %2 {
      %cst_10 = arith.constant 0.000000e+00 : f32
      %12 = vector.broadcast %cst_10 : f32 to vector<16x32xf32>
      %c0_11 = arith.constant 0 : index
      %c0_12 = arith.constant 0 : index
      %13 = vector.load %arg8[%c0_11, %c0_12] : memref<16x32xf32, #tpu.memory_space<vmem>>, vector<16x32xf32>
      tpu.vector_store %arg8[%c0_11, %c0_12], %12 {strides = array<i32>} : memref<16x32xf32, #tpu.memory_space<vmem>>, vector<16x32xf32>,
    } else {
    }
    %c0 = arith.constant 0 : index
    %c0_1 = arith.constant 0 : index
    %3 = vector.load %arg3[%c0, %c0_1] : memref<16x32xbf16, #tpu.memory_space<vmem>>, vector<16x32xbf16>
    %c0_2 = arith.constant 0 : index
    %c0_3 = arith.constant 0 : index
    %4 = vector.load %arg8[%c0_2, %c0_3] : memref<16x32xf32, #tpu.memory_space<vmem>>, vector<16x32xf32>
    %c0_4 = arith.constant 0 : index
    %c0_5 = arith.constant 0 : index
    %5 = vector.load %arg4[%c0_4, %c0_5] : memref<32x32xbf16, #tpu.memory_space<vmem>>, vector<32x32xbf16>
    %cst = arith.constant dense<0.000000e+00> : vector<16x32xf32>
    %6 = tpu.matmul %3, %5, %cst {dimension_numbers = #tpu.dot_dimension_numbers<[1], [0], [0], [1], [0, 0, 1, 1], [], []>} : vector<16x32xbf16>, vector<32x32xbf16>, vector<16x32xf32> -> vector<16x32xf32>
    %7 = arith.addf %4, %6 : vector<16x32xf32>
    %c0_6 = arith.constant 0 : index
    %c0_7 = arith.constant 0 : index
    %8 = vector.load %arg8[%c0_6, %c0_7] : memref<16x32xf32, #tpu.memory_space<vmem>>, vector<16x32xf32>
    tpu.vector_store %arg8[%c0_6, %c0_7], %7 {strides = array<i32>} : memref<16x32xf32, #tpu.memory_space<vmem>>, vector<16x32xf32>,
    %c0_i32_8 = arith.constant 0 : i32
    %9 = arith.cmpi eq, %arg2, %c0_i32_8 : i32
    %10 = arith.extui %9 : i1 to i32
    %c0_i32_9 = arith.constant 0 : i32
    %11 = arith.cmpi ne, %10, %c0_i32_9 : i32
    scf.if %11 {
      %c0_10 = arith.constant 0 : index
      %c0_11 = arith.constant 0 : index
      %12 = vector.load %arg8[%c0_10, %c0_11] : memref<16x32xf32, #tpu.memory_space<vmem>>, vector<16x32xf32>
      %c0_12 = arith.constant 0 : index
      %c0_13 = arith.constant 0 : index
      %13 = vector.load %arg5[%c0_12, %c0_13] : memref<1x32xf32, #tpu.memory_space<vmem>>, vector<1x32xf32>
      %14 = vector.broadcast %13 : vector<1x32xf32> to vector<16x32xf32>
      %15 = arith.addf %12, %14 : vector<16x32xf32>
      %c0_14 = arith.constant 0 : index
      %c0_15 = arith.constant 0 : index
      %16 = vector.load %arg6[%c0_14, %c0_15] : memref<16x32xbf16, #tpu.memory_space<vmem>>, vector<16x32xbf16>
      %17 = arith.extf %16 : vector<16x32xbf16> to vector<16x32xf32>
      %18 = arith.addf %15, %17 : vector<16x32xf32>
      %19 = arith.truncf %18 : vector<16x32xf32> to vector<16x32xbf16>
      %c0_16 = arith.constant 0 : index
      %c0_17 = arith.constant 0 : index
      %20 = vector.load %arg7[%c0_16, %c0_17] : memref<16x32xbf16, #tpu.memory_space<vmem>>, vector<16x32xbf16>
      tpu.vector_store %arg7[%c0_16, %c0_17], %19 {strides = array<i32>} : memref<16x32xbf16, #tpu.memory_space<vmem>>, vector<16x32xbf16>,
    } else {
    }
    return
  }
  func.func @transform_0(%arg0: i32, %arg1: i32, %arg2: i32) -> (i32, i32) {
    %c0_i32 = arith.constant 0 : i32
    return %arg0, %arg2 : i32, i32
  }
  func.func @transform_1(%arg0: i32, %arg1: i32, %arg2: i32) -> (i32, i32) {
    %c0_i32 = arith.constant 0 : i32
    return %arg2, %arg1 : i32, i32
  }
  func.func @transform_2(%arg0: i32, %arg1: i32, %arg2: i32) -> (i32, i32) {
    %c0_i32 = arith.constant 0 : i32
    %c0_i32_0 = arith.constant 0 : i32
    return %c0_i32, %arg1 : i32, i32
  }
  func.func @transform_3(%arg0: i32, %arg1: i32, %arg2: i32) -> (i32, i32) {
    %c0_i32 = arith.constant 0 : i32
    return %arg0, %arg1 : i32, i32
  }
  func.func @transform_4(%arg0: i32, %arg1: i32, %arg2: i32) -> (i32, i32) {
    %c0_i32 = arith.constant 0 : i32
    return %arg0, %arg1 : i32, i32
  }
}

module attributes {stable_mosaic.version = 11 : i64} {
  func.func @_gemm_kernel(%arg0: i32, %arg1: i32, %arg2: i32, %arg3: memref<16x32xbf16, #tpu.memory_space<vmem>>, %arg4: memref<1x32xf32, #tpu.memory_space<vmem>>, %arg5: memref<1x32xf32, #tpu.memory_space<vmem>>, %arg6: memref<32x128xbf16, #tpu.memory_space<vmem>>, %arg7: memref<1x128xf32, #tpu.memory_space<vmem>>, %arg8: memref<16x128xbf16, #tpu.memory_space<vmem>>, %arg9: memref<16x128xf32, #tpu.memory_space<vmem>>) attributes {dimension_semantics = [#tpu.dimension_semantics<parallel>, #tpu.dimension_semantics<parallel>, #tpu.dimension_semantics<arbitrary>], iteration_bounds = array<i64: 1, 1, 1>, scalar_prefetch = 0 : i64, scratch_operands = 1 : i64, tpu.core_type = #tpu.core_type<tc>, window_params = [{transform_indices = @transform_0, window_bounds = array<i64: 16, 32>}, {pipeline_mode = #tpu.pipeline_mode<synchronous>, transform_indices = @transform_1, window_bounds = array<i64: 1, 32>}, {pipeline_mode = #tpu.pipeline_mode<synchronous>, transform_indices = @transform_2, window_bounds = array<i64: 1, 32>}, {transform_indices = @transform_3, window_bounds = array<i64: 32, 128>}, {transform_indices = @transform_4, window_bounds = array<i64: 1, 128>}, {transform_indices = @transform_5, window_bounds = array<i64: 16, 128>}]} {
    %c0_i32 = arith.constant 0 : i32
    %0 = arith.cmpi eq, %arg2, %c0_i32 : i32
    %1 = arith.extui %0 : i1 to i32
    %c0_i32_0 = arith.constant 0 : i32
    %2 = arith.cmpi ne, %1, %c0_i32_0 : i32
    scf.if %2 {
      %cst_19 = arith.constant 0.000000e+00 : f32
      %36 = vector.broadcast %cst_19 : f32 to vector<16x128xf32>
      %c0_20 = arith.constant 0 : index
      %c0_21 = arith.constant 0 : index
      %37 = vector.load %arg9[%c0_20, %c0_21] : memref<16x128xf32, #tpu.memory_space<vmem>>, vector<16x128xf32>
      tpu.vector_store %arg9[%c0_20, %c0_21], %36 {strides = array<i32>} : memref<16x128xf32, #tpu.memory_space<vmem>>, vector<16x128xf32>,
    } else {
    }
    %c0 = arith.constant 0 : index
    %c0_1 = arith.constant 0 : index
    %3 = vector.load %arg3[%c0, %c0_1] : memref<16x32xbf16, #tpu.memory_space<vmem>>, vector<16x32xbf16>
    %4 = arith.extf %3 : vector<16x32xbf16> to vector<16x32xf32>
    %cst = arith.constant dense<0.000000e+00> : vector<16xf32>
    %5 = vector.multi_reduction <add>, %4, %cst [1] : vector<16x32xf32> to vector<16xf32>
    %6 = vector.shape_cast %5 : vector<16xf32> to vector<16x1xf32>
    %cst_2 = arith.constant 3.200000e+01 : f32
    %7 = vector.broadcast %cst_2 : f32 to vector<16x1xf32>
    %8 = arith.divf %6, %7 : vector<16x1xf32>
    %9 = vector.broadcast %8 : vector<16x1xf32> to vector<16x32xf32>
    %10 = arith.subf %4, %9 : vector<16x32xf32>
    %11 = arith.mulf %10, %10 : vector<16x32xf32>
    %cst_3 = arith.constant dense<0.000000e+00> : vector<16xf32>
    %12 = vector.multi_reduction <add>, %11, %cst_3 [1] : vector<16x32xf32> to vector<16xf32>
    %13 = vector.shape_cast %12 : vector<16xf32> to vector<16x1xf32>
    %cst_4 = arith.constant 3.200000e+01 : f32
    %14 = vector.broadcast %cst_4 : f32 to vector<16x1xf32>
    %15 = arith.divf %13, %14 : vector<16x1xf32>
    %cst_5 = arith.constant 9.99999974E-6 : f32
    %16 = vector.broadcast %cst_5 : f32 to vector<16x1xf32>
    %17 = arith.addf %15, %16 : vector<16x1xf32>
    %18 = math.rsqrt %17 : vector<16x1xf32>
    %19 = vector.broadcast %18 : vector<16x1xf32> to vector<16x32xf32>
    %20 = arith.mulf %10, %19 : vector<16x32xf32>
    %c0_6 = arith.constant 0 : index
    %c0_7 = arith.constant 0 : index
    %21 = vector.load %arg4[%c0_6, %c0_7] : memref<1x32xf32, #tpu.memory_space<vmem>>, vector<1x32xf32>
    %22 = vector.broadcast %21 : vector<1x32xf32> to vector<16x32xf32>
    %23 = arith.mulf %20, %22 : vector<16x32xf32>
    %c0_8 = arith.constant 0 : index
    %c0_9 = arith.constant 0 : index
    %24 = vector.load %arg5[%c0_8, %c0_9] : memref<1x32xf32, #tpu.memory_space<vmem>>, vector<1x32xf32>
    %25 = vector.broadcast %24 : vector<1x32xf32> to vector<16x32xf32>
    %26 = arith.addf %23, %25 : vector<16x32xf32>
    %27 = arith.truncf %26 : vector<16x32xf32> to vector<16x32xbf16>
    %c0_10 = arith.constant 0 : index
    %c0_11 = arith.constant 0 : index
    %28 = vector.load %arg9[%c0_10, %c0_11] : memref<16x128xf32, #tpu.memory_space<vmem>>, vector<16x128xf32>
    %c0_12 = arith.constant 0 : index
    %c0_13 = arith.constant 0 : index
    %29 = vector.load %arg6[%c0_12, %c0_13] : memref<32x128xbf16, #tpu.memory_space<vmem>>, vector<32x128xbf16>
    %cst_14 = arith.constant dense<0.000000e+00> : vector<16x128xf32>
    %30 = tpu.matmul %27, %29, %cst_14 {dimension_numbers = #tpu.dot_dimension_numbers<[1], [0], [0], [1], [0, 0, 1, 1], [], []>} : vector<16x32xbf16>, vector<32x128xbf16>, vector<16x128xf32> -> vector<16x128xf32>
    %31 = arith.addf %28, %30 : vector<16x128xf32>
    %c0_15 = arith.constant 0 : index
    %c0_16 = arith.constant 0 : index
    %32 = vector.load %arg9[%c0_15, %c0_16] : memref<16x128xf32, #tpu.memory_space<vmem>>, vector<16x128xf32>
    tpu.vector_store %arg9[%c0_15, %c0_16], %31 {strides = array<i32>} : memref<16x128xf32, #tpu.memory_space<vmem>>, vector<16x128xf32>,
    %c0_i32_17 = arith.constant 0 : i32
    %33 = arith.cmpi eq, %arg2, %c0_i32_17 : i32
    %34 = arith.extui %33 : i1 to i32
    %c0_i32_18 = arith.constant 0 : i32
    %35 = arith.cmpi ne, %34, %c0_i32_18 : i32
    scf.if %35 {
      %c0_19 = arith.constant 0 : index
      %c0_20 = arith.constant 0 : index
      %36 = vector.load %arg9[%c0_19, %c0_20] : memref<16x128xf32, #tpu.memory_space<vmem>>, vector<16x128xf32>
      %c0_21 = arith.constant 0 : index
      %c0_22 = arith.constant 0 : index
      %37 = vector.load %arg7[%c0_21, %c0_22] : memref<1x128xf32, #tpu.memory_space<vmem>>, vector<1x128xf32>
      %38 = vector.broadcast %37 : vector<1x128xf32> to vector<16x128xf32>
      %39 = arith.addf %36, %38 : vector<16x128xf32>
      %cst_23 = arith.constant 5.000000e-01 : f32
      %40 = vector.broadcast %cst_23 : f32 to vector<16x128xf32>
      %41 = arith.mulf %40, %39 : vector<16x128xf32>
      %cst_24 = arith.constant 4.471500e-02 : f32
      %42 = vector.broadcast %cst_24 : f32 to vector<16x128xf32>
      %43 = arith.mulf %42, %39 : vector<16x128xf32>
      %44 = arith.mulf %43, %39 : vector<16x128xf32>
      %45 = arith.mulf %44, %39 : vector<16x128xf32>
      %46 = arith.addf %39, %45 : vector<16x128xf32>
      %cst_25 = arith.constant 0.797884583 : f32
      %47 = vector.broadcast %cst_25 : f32 to vector<16x128xf32>
      %48 = arith.mulf %47, %46 : vector<16x128xf32>
      %49 = math.tanh %48 : vector<16x128xf32>
      %cst_26 = arith.constant 1.000000e+00 : f32
      %50 = vector.broadcast %cst_26 : f32 to vector<16x128xf32>
      %51 = arith.addf %50, %49 : vector<16x128xf32>
      %52 = arith.mulf %41, %51 : vector<16x128xf32>
      %53 = arith.truncf %52 : vector<16x128xf32> to vector<16x128xbf16>
      %c0_27 = arith.constant 0 : index
      %c0_28 = arith.constant 0 : index
      %54 = vector.load %arg8[%c0_27, %c0_28] : memref<16x128xbf16, #tpu.memory_space<vmem>>, vector<16x128xbf16>
      tpu.vector_store %arg8[%c0_27, %c0_28], %53 {strides = array<i32>} : memref<16x128xbf16, #tpu.memory_space<vmem>>, vector<16x128xbf16>,
    } else {
    }
    return
  }
  func.func @transform_0(%arg0: i32, %arg1: i32, %arg2: i32) -> (i32, i32) {
    %c0_i32 = arith.constant 0 : i32
    return %arg0, %arg2 : i32, i32
  }
  func.func @transform_1(%arg0: i32, %arg1: i32, %arg2: i32) -> (i32, i32) {
    %c0_i32 = arith.constant 0 : i32
    %c0_i32_0 = arith.constant 0 : i32
    %c0_i32_1 = arith.constant 0 : i32
    return %c0_i32, %c0_i32_0 : i32, i32
  }
  func.func @transform_2(%arg0: i32, %arg1: i32, %arg2: i32) -> (i32, i32) {
    %c0_i32 = arith.constant 0 : i32
    %c0_i32_0 = arith.constant 0 : i32
    %c0_i32_1 = arith.constant 0 : i32
    return %c0_i32, %c0_i32_0 : i32, i32
  }
  func.func @transform_3(%arg0: i32, %arg1: i32, %arg2: i32) -> (i32, i32) {
    %c0_i32 = arith.constant 0 : i32
    return %arg2, %arg1 : i32, i32
  }
  func.func @transform_4(%arg0: i32, %arg1: i32, %arg2: i32) -> (i32, i32) {
    %c0_i32 = arith.constant 0 : i32
    %c0_i32_0 = arith.constant 0 : i32
    return %c0_i32, %arg1 : i32, i32
  }
  func.func @transform_5(%arg0: i32, %arg1: i32, %arg2: i32) -> (i32, i32) {
    %c0_i32 = arith.constant 0 : i32
    return %arg0, %arg1 : i32, i32
  }
}

module attributes {stable_mosaic.version = 11 : i64} {
  func.func @_gemm_kernel(%arg0: i32, %arg1: i32, %arg2: i32, %arg3: memref<16x128xbf16, #tpu.memory_space<vmem>>, %arg4: memref<128x32xbf16, #tpu.memory_space<vmem>>, %arg5: memref<1x32xf32, #tpu.memory_space<vmem>>, %arg6: memref<16x32xbf16, #tpu.memory_space<vmem>>, %arg7: memref<16x32xbf16, #tpu.memory_space<vmem>>, %arg8: memref<16x32xf32, #tpu.memory_space<vmem>>) attributes {dimension_semantics = [#tpu.dimension_semantics<parallel>, #tpu.dimension_semantics<parallel>, #tpu.dimension_semantics<arbitrary>], iteration_bounds = array<i64: 1, 1, 1>, scalar_prefetch = 0 : i64, scratch_operands = 1 : i64, tpu.core_type = #tpu.core_type<tc>, window_params = [{transform_indices = @transform_0, window_bounds = array<i64: 16, 128>}, {transform_indices = @transform_1, window_bounds = array<i64: 128, 32>}, {transform_indices = @transform_2, window_bounds = array<i64: 1, 32>}, {transform_indices = @transform_3, window_bounds = array<i64: 16, 32>}, {transform_indices = @transform_4, window_bounds = array<i64: 16, 32>}]} {
    %c0_i32 = arith.constant 0 : i32
    %0 = arith.cmpi eq, %arg2, %c0_i32 : i32
    %1 = arith.extui %0 : i1 to i32
    %c0_i32_0 = arith.constant 0 : i32
    %2 = arith.cmpi ne, %1, %c0_i32_0 : i32
    scf.if %2 {
      %cst_10 = arith.constant 0.000000e+00 : f32
      %12 = vector.broadcast %cst_10 : f32 to vector<16x32xf32>
      %c0_11 = arith.constant 0 : index
      %c0_12 = arith.constant 0 : index
      %13 = vector.load %arg8[%c0_11, %c0_12] : memref<16x32xf32, #tpu.memory_space<vmem>>, vector<16x32xf32>
      tpu.vector_store %arg8[%c0_11, %c0_12], %12 {strides = array<i32>} : memref<16x32xf32, #tpu.memory_space<vmem>>, vector<16x32xf32>,
    } else {
    }
    %c0 = arith.constant 0 : index
    %c0_1 = arith.constant 0 : index
    %3 = vector.load %arg3[%c0, %c0_1] : memref<16x128xbf16, #tpu.memory_space<vmem>>, vector<16x128xbf16>
    %c0_2 = arith.constant 0 : index
    %c0_3 = arith.constant 0 : index
    %4 = vector.load %arg8[%c0_2, %c0_3] : memref<16x32xf32, #tpu.memory_space<vmem>>, vector<16x32xf32>
    %c0_4 = arith.constant 0 : index
    %c0_5 = arith.constant 0 : index
    %5 = vector.load %arg4[%c0_4, %c0_5] : memref<128x32xbf16, #tpu.memory_space<vmem>>, vector<128x32xbf16>
    %cst = arith.constant dense<0.000000e+00> : vector<16x32xf32>
    %6 = tpu.matmul %3, %5, %cst {dimension_numbers = #tpu.dot_dimension_numbers<[1], [0], [0], [1], [0, 0, 1, 1], [], []>} : vector<16x128xbf16>, vector<128x32xbf16>, vector<16x32xf32> -> vector<16x32xf32>
    %7 = arith.addf %4, %6 : vector<16x32xf32>
    %c0_6 = arith.constant 0 : index
    %c0_7 = arith.constant 0 : index
    %8 = vector.load %arg8[%c0_6, %c0_7] : memref<16x32xf32, #tpu.memory_space<vmem>>, vector<16x32xf32>
    tpu.vector_store %arg8[%c0_6, %c0_7], %7 {strides = array<i32>} : memref<16x32xf32, #tpu.memory_space<vmem>>, vector<16x32xf32>,
    %c0_i32_8 = arith.constant 0 : i32
    %9 = arith.cmpi eq, %arg2, %c0_i32_8 : i32
    %10 = arith.extui %9 : i1 to i32
    %c0_i32_9 = arith.constant 0 : i32
    %11 = arith.cmpi ne, %10, %c0_i32_9 : i32
    scf.if %11 {
      %c0_10 = arith.constant 0 : index
      %c0_11 = arith.constant 0 : index
      %12 = vector.load %arg8[%c0_10, %c0_11] : memref<16x32xf32, #tpu.memory_space<vmem>>, vector<16x32xf32>
      %c0_12 = arith.constant 0 : index
      %c0_13 = arith.constant 0 : index
      %13 = vector.load %arg5[%c0_12, %c0_13] : memref<1x32xf32, #tpu.memory_space<vmem>>, vector<1x32xf32>
      %14 = vector.broadcast %13 : vector<1x32xf32> to vector<16x32xf32>
      %15 = arith.addf %12, %14 : vector<16x32xf32>
      %c0_14 = arith.constant 0 : index
      %c0_15 = arith.constant 0 : index
      %16 = vector.load %arg6[%c0_14, %c0_15] : memref<16x32xbf16, #tpu.memory_space<vmem>>, vector<16x32xbf16>
      %17 = arith.extf %16 : vector<16x32xbf16> to vector<16x32xf32>
      %18 = arith.addf %15, %17 : vector<16x32xf32>
      %19 = arith.truncf %18 : vector<16x32xf32> to vector<16x32xbf16>
      %c0_16 = arith.constant 0 : index
      %c0_17 = arith.constant 0 : index
      %20 = vector.load %arg7[%c0_16, %c0_17] : memref<16x32xbf16, #tpu.memory_space<vmem>>, vector<16x32xbf16>
      tpu.vector_store %arg7[%c0_16, %c0_17], %19 {strides = array<i32>} : memref<16x32xbf16, #tpu.memory_space<vmem>>, vector<16x32xbf16>,
    } else {
    }
    return
  }
  func.func @transform_0(%arg0: i32, %arg1: i32, %arg2: i32) -> (i32, i32) {
    %c0_i32 = arith.constant 0 : i32
    return %arg0, %arg2 : i32, i32
  }
  func.func @transform_1(%arg0: i32, %arg1: i32, %arg2: i32) -> (i32, i32) {
    %c0_i32 = arith.constant 0 : i32
    return %arg2, %arg1 : i32, i32
  }
  func.func @transform_2(%arg0: i32, %arg1: i32, %arg2: i32) -> (i32, i32) {
    %c0_i32 = arith.constant 0 : i32
    %c0_i32_0 = arith.constant 0 : i32
    return %c0_i32, %arg1 : i32, i32
  }
  func.func @transform_3(%arg0: i32, %arg1: i32, %arg2: i32) -> (i32, i32) {
    %c0_i32 = arith.constant 0 : i32
    return %arg0, %arg1 : i32, i32
  }
  func.func @transform_4(%arg0: i32, %arg1: i32, %arg2: i32) -> (i32, i32) {
    %c0_i32 = arith.constant 0 : i32
    return %arg0, %arg1 : i32, i32
  }
}

module attributes {stable_mosaic.version = 11 : i64} {
  func.func @_gemm_kernel(%arg0: i32, %arg1: i32, %arg2: i32, %arg3: memref<16x32xbf16, #tpu.memory_space<vmem>>, %arg4: memref<1x32xf32, #tpu.memory_space<vmem>>, %arg5: memref<1x32xf32, #tpu.memory_space<vmem>>, %arg6: memref<32x128xbf16, #tpu.memory_space<vmem>>, %arg7: memref<16x128xf32, #tpu.memory_space<vmem>>, %arg8: memref<16x128xf32, #tpu.memory_space<vmem>>) attributes {dimension_semantics = [#tpu.dimension_semantics<parallel>, #tpu.dimension_semantics<parallel>, #tpu.dimension_semantics<arbitrary>], iteration_bounds = array<i64: 1, 1, 1>, scalar_prefetch = 0 : i64, scratch_operands = 1 : i64, tpu.core_type = #tpu.core_type<tc>, window_params = [{transform_indices = @transform_0, window_bounds = array<i64: 16, 32>}, {pipeline_mode = #tpu.pipeline_mode<synchronous>, transform_indices = @transform_1, window_bounds = array<i64: 1, 32>}, {pipeline_mode = #tpu.pipeline_mode<synchronous>, transform_indices = @transform_2, window_bounds = array<i64: 1, 32>}, {transform_indices = @transform_3, window_bounds = array<i64: 32, 128>}, {transform_indices = @transform_4, window_bounds = array<i64: 16, 128>}]} {
    %c0_i32 = arith.constant 0 : i32
    %0 = arith.cmpi eq, %arg2, %c0_i32 : i32
    %1 = arith.extui %0 : i1 to i32
    %c0_i32_0 = arith.constant 0 : i32
    %2 = arith.cmpi ne, %1, %c0_i32_0 : i32
    scf.if %2 {
      %cst_19 = arith.constant 0.000000e+00 : f32
      %36 = vector.broadcast %cst_19 : f32 to vector<16x128xf32>
      %c0_20 = arith.constant 0 : index
      %c0_21 = arith.constant 0 : index
      %37 = vector.load %arg8[%c0_20, %c0_21] : memref<16x128xf32, #tpu.memory_space<vmem>>, vector<16x128xf32>
      tpu.vector_store %arg8[%c0_20, %c0_21], %36 {strides = array<i32>} : memref<16x128xf32, #tpu.memory_space<vmem>>, vector<16x128xf32>,
    } else {
    }
    %c0 = arith.constant 0 : index
    %c0_1 = arith.constant 0 : index
    %3 = vector.load %arg3[%c0, %c0_1] : memref<16x32xbf16, #tpu.memory_space<vmem>>, vector<16x32xbf16>
    %4 = arith.extf %3 : vector<16x32xbf16> to vector<16x32xf32>
    %cst = arith.constant dense<0.000000e+00> : vector<16xf32>
    %5 = vector.multi_reduction <add>, %4, %cst [1] : vector<16x32xf32> to vector<16xf32>
    %6 = vector.shape_cast %5 : vector<16xf32> to vector<16x1xf32>
    %cst_2 = arith.constant 3.200000e+01 : f32
    %7 = vector.broadcast %cst_2 : f32 to vector<16x1xf32>
    %8 = arith.divf %6, %7 : vector<16x1xf32>
    %9 = vector.broadcast %8 : vector<16x1xf32> to vector<16x32xf32>
    %10 = arith.subf %4, %9 : vector<16x32xf32>
    %11 = arith.mulf %10, %10 : vector<16x32xf32>
    %cst_3 = arith.constant dense<0.000000e+00> : vector<16xf32>
    %12 = vector.multi_reduction <add>, %11, %cst_3 [1] : vector<16x32xf32> to vector<16xf32>
    %13 = vector.shape_cast %12 : vector<16xf32> to vector<16x1xf32>
    %cst_4 = arith.constant 3.200000e+01 : f32
    %14 = vector.broadcast %cst_4 : f32 to vector<16x1xf32>
    %15 = arith.divf %13, %14 : vector<16x1xf32>
    %cst_5 = arith.constant 9.99999974E-6 : f32
    %16 = vector.broadcast %cst_5 : f32 to vector<16x1xf32>
    %17 = arith.addf %15, %16 : vector<16x1xf32>
    %18 = math.rsqrt %17 : vector<16x1xf32>
    %19 = vector.broadcast %18 : vector<16x1xf32> to vector<16x32xf32>
    %20 = arith.mulf %10, %19 : vector<16x32xf32>
    %c0_6 = arith.constant 0 : index
    %c0_7 = arith.constant 0 : index
    %21 = vector.load %arg4[%c0_6, %c0_7] : memref<1x32xf32, #tpu.memory_space<vmem>>, vector<1x32xf32>
    %22 = vector.broadcast %21 : vector<1x32xf32> to vector<16x32xf32>
    %23 = arith.mulf %20, %22 : vector<16x32xf32>
    %c0_8 = arith.constant 0 : index
    %c0_9 = arith.constant 0 : index
    %24 = vector.load %arg5[%c0_8, %c0_9] : memref<1x32xf32, #tpu.memory_space<vmem>>, vector<1x32xf32>
    %25 = vector.broadcast %24 : vector<1x32xf32> to vector<16x32xf32>
    %26 = arith.addf %23, %25 : vector<16x32xf32>
    %27 = arith.truncf %26 : vector<16x32xf32> to vector<16x32xbf16>
    %c0_10 = arith.constant 0 : index
    %c0_11 = arith.constant 0 : index
    %28 = vector.load %arg8[%c0_10, %c0_11] : memref<16x128xf32, #tpu.memory_space<vmem>>, vector<16x128xf32>
    %c0_12 = arith.constant 0 : index
    %c0_13 = arith.constant 0 : index
    %29 = vector.load %arg6[%c0_12, %c0_13] : memref<32x128xbf16, #tpu.memory_space<vmem>>, vector<32x128xbf16>
    %cst_14 = arith.constant dense<0.000000e+00> : vector<16x128xf32>
    %30 = tpu.matmul %27, %29, %cst_14 {dimension_numbers = #tpu.dot_dimension_numbers<[1], [0], [0], [1], [0, 0, 1, 1], [], []>} : vector<16x32xbf16>, vector<32x128xbf16>, vector<16x128xf32> -> vector<16x128xf32>
    %31 = arith.addf %28, %30 : vector<16x128xf32>
    %c0_15 = arith.constant 0 : index
    %c0_16 = arith.constant 0 : index
    %32 = vector.load %arg8[%c0_15, %c0_16] : memref<16x128xf32, #tpu.memory_space<vmem>>, vector<16x128xf32>
    tpu.vector_store %arg8[%c0_15, %c0_16], %31 {strides = array<i32>} : memref<16x128xf32, #tpu.memory_space<vmem>>, vector<16x128xf32>,
    %c0_i32_17 = arith.constant 0 : i32
    %33 = arith.cmpi eq, %arg2, %c0_i32_17 : i32
    %34 = arith.extui %33 : i1 to i32
    %c0_i32_18 = arith.constant 0 : i32
    %35 = arith.cmpi ne, %34, %c0_i32_18 : i32
    scf.if %35 {
      %c0_19 = arith.constant 0 : index
      %c0_20 = arith.constant 0 : index
      %36 = vector.load %arg8[%c0_19, %c0_20] : memref<16x128xf32, #tpu.memory_space<vmem>>, vector<16x128xf32>
      %c0_21 = arith.constant 0 : index
      %c0_22 = arith.constant 0 : index
      %37 = vector.load %arg7[%c0_21, %c0_22] : memref<16x128xf32, #tpu.memory_space<vmem>>, vector<16x128xf32>
      tpu.vector_store %arg7[%c0_21, %c0_22], %36 {strides = array<i32>} : memref<16x128xf32, #tpu.memory_space<vmem>>, vector<16x128xf32>,
    } else {
    }
    return
  }
  func.func @transform_0(%arg0: i32, %arg1: i32, %arg2: i32) -> (i32, i32) {
    %c0_i32 = arith.constant 0 : i32
    return %arg0, %arg2 : i32, i32
  }
  func.func @transform_1(%arg0: i32, %arg1: i32, %arg2: i32) -> (i32, i32) {
    %c0_i32 = arith.constant 0 : i32
    %c0_i32_0 = arith.constant 0 : i32
    %c0_i32_1 = arith.constant 0 : i32
    return %c0_i32, %c0_i32_0 : i32, i32
  }
  func.func @transform_2(%arg0: i32, %arg1: i32, %arg2: i32) -> (i32, i32) {
    %c0_i32 = arith.constant 0 : i32
    %c0_i32_0 = arith.constant 0 : i32
    %c0_i32_1 = arith.constant 0 : i32
    return %c0_i32, %c0_i32_0 : i32, i32
  }
  func.func @transform_3(%arg0: i32, %arg1: i32, %arg2: i32) -> (i32, i32) {
    %c0_i32 = arith.constant 0 : i32
    return %arg2, %arg1 : i32, i32
  }
  func.func @transform_4(%arg0: i32, %arg1: i32, %arg2: i32) -> (i32, i32) {
    %c0_i32 = arith.constant 0 : i32
    return %arg0, %arg1 : i32, i32
  }
}

</mosaic_0001>

<bundles_post_ra>
// kernel: gpt_forward.12
= control target key start
LH: loop header
LB: loop body
LE: loop exit
PB: predicated region body
PF: predicated region fallthrough
CT: control target
= control target key end

     0   :  { %s655_s12 = smov 0   ;;  %s657_s13 = smov 0   ;;  %s711_s0 = inlined_call_operand.vmem [shape: bf16[8,8,8], index: 0, kind: input, shape index: {}]   ;;  %s712_s1 = inlined_call_operand.vmem [shape: bf16[8,8,8], index: 1, kind: input, shape index: {}]   ;;  %s713_s2 = inlined_call_operand.vmem [shape: bf16[8,8,8], index: 2, kind: input, shape index: {}]   ;;  %s714_s3 = inlined_call_operand.vmem [shape: bf16[8,8,8], index: 3, kind: output, shape index: {}]  }
   0x1   :  { %s659_s14 = smov 0  }
   0x2 LB: > { %s32_s15 = sadd.s32 1, %s625_s13  ;;  %p546_p0 = scmp.ge.s32.totalorder %s629_s14, 1  ;;  %s629_s14 = sphi %s659_s14, %s13_s14   ;;  %s625_s13 = sphi %s657_s13, %s716_s13   ;;  %s621_s12 = sphi %s655_s12, %s715_s12  }
   0x3   : > { %p34_p1 = scmp.ge.s32.totalorder %s32_s15, 8  ;;  %p190_p2 = scmp.lt.s32.totalorder %s629_s14, 9 }
   0x5   : > { %s718_s15 = smov (%p34_p1, %s32_s15), 0  ;;  %p191_p3 = pnand %p546_p0, %p190_p2 }
   0x6   : > { %p232_p4 = scmp.lt.s32.totalorder (!%p191_p3), %s621_s12, 7 }
   0x7   : > { %194 = sbr.rel (%p191_p3) target bundleno = 795 (0x31b), region = 32 }
   0xc   : > { %vm268_vm0 = vcmask 64512   ;;  %v631_v0 = vmov 0.0   ;;  %vm632_vm1 = vmmov 0   ;;  %s720_s12 = smov (!%p232_p4, %s621_s12), 7  ;;  %vm265_vm2 = vcmask 7168  }
   0xd   : > { %559 = vmatprep.subr.bf16.mxu0 %v631_v0  ;;  %269 = vst.msk [vmem:[#allocation4] sm:$0xff] %vm268_vm0, %v631_v0  ;;  %561 = vmatprep.mubr.msk.bf16.mxu0 %vm632_vm1, %v631_v0  ;;  %s674_s16 = sshll.u32 %s720_s12, 2  ;;  %v633_v4 = vmov -inf   ;;  %v327_v5 = vlaneseq  ;;  %v634_v15 = vmov 0   ;;  %vm373_vm4 = vcmask 1043456  }
   0xe   : > { %565 = vmatprep.subr.bf16.mxu1 %v631_v0  ;;  %567 = vmatprep.mubr.msk.bf16.mxu1 %vm632_vm1, %v631_v0  ;;  %s245_s19 = scalar_lea.vmem %s712_s1, %s674_s16  ;;  %s238_s22 = scalar_lea.vmem %s711_s0, %s674_s16  ;;  %266 = vst.msk [vmem:[#allocation2] sm:$0xff] %vm265_vm2, %v633_v4  ;;  %267 = vst.msk [vmem:[#allocation3] sm:$0xff] %vm265_vm2, %v631_v0  ;;  %vm433_vm5 = vcmask 60416  }
   0xf   : > { %v278_v1 = vld [vmem:[%s245_s19] sm:$0xf]  ;;  %v328_v6 = vshrl.u32 %v327_v5, 7  ;;  %v332_v7 = vand.u32 127, %v327_v5  ;;  %599 = vset.pattern.permute.xlu0 %v634_v15  ;;  %600 = vset.pattern.permute.xlu1 %v634_v15  ;;  %s252_s25 = scalar_lea.vmem %s713_s2, %s674_s16  ;;  %s259_s28 = scalar_lea.vmem %s714_s3, %s674_s16 }
  0x10   : > { %v284_v2 = vsel %vm268_vm0, %v278_v1, 0  ;;  %v277_v3 = vld [vmem:[%s238_s22] sm:$0xf] }
  0x11   : > { %560 = vmatpush3.bf16.xpose.msra.mxu0 %v284_v2  ;;  %vm335_vm3 = vcmp.le.s32.totalorder %v332_v7, %v328_v6  ;;  %v369_v20 = vld [vmem:[%s252_s25] sm:$0xf] }
  0x12   : > { %v375_v21 = vsel %vm373_vm4, %v369_v20, 0 }
  0x13   : > { %566 = vmatpush3.bf16.msra.mxu1 %v375_v21 }
  0x14   : > { %v361_v36 = vld [vmem:[#allocation4] sm:$0xff] }
  0x15   : > { %v337_v16 = vld [vmem:[#allocation2] sm:$0xff]  ;;  %v353_v30 = vld [vmem:[#allocation3] sm:$0xff] }
  0x18   : > { %562 = vmatmul.mubr.msk.bf16.vlgmr.msra.gmra.mxu0 %vm268_vm0, %v277_v3 }
  0xd8   : > { %v320_v8 = vpop.f32.mrf.mxu0 }
  0xd9   : > { %v326_v9 = vmul.f32 0.35355338, %v320_v8 }
  0xda   : > { %v563_v10 = vpop.f32.mrf.mxu0 }
  0xdb   : > { %v336_v11 = vsel %vm335_vm3, %v326_v9, -1e+30 }
  0xdc   : > { %v323_v12 = vpop.f32.mrf.mxu0  ;;  %v338_v13 = vsel %vm268_vm0, %v336_v11, -inf }
  0xdd   : > { %339 = vmax.xlane.f32.xlu0 %v338_v13 }
  0xde   : > { %v564_v14 = vpop.f32.mrf.mxu0 }
 0x166   : > { %v340_v17 = vpop.xlane.xlu0 %339 }
 0x167   : > { %v341_v18 = vmax.f32 %v337_v16, %v340_v17 }
 0x169   : > { %v342_v19 = vsub.f32 %v337_v16, %v341_v18  ;;  %419 = vst.msk [vmem:[#allocation2] sm:$0xff] %vm265_vm2, %v341_v18  ;;  %347 = vperm.xlu0 %599, %v341_v18  }
 0x16b   : > { %v343_v26 = vmul.f32 1.442695, %v342_v19 }
 0x1e4   : > { %v348_v22 = vpop.permute.xlu0 %347 }
 0x1e5   : > { %v350_v23 = vsub.f32 %v336_v11, %v348_v22 }
 0x1e7   : > { %v351_v24 = vmul.f32 1.442695, %v350_v23 }
 0x1e9   : > { %601 = vpow2.f32 %v351_v24 }
 0x1ea   : > { %603 = vpow2.f32 %v343_v26 }
 0x1f6   : > { %v602_v25 = vpop.eup %601 }
 0x1f7   : > { %v355_v27 = vsel %vm268_vm0, %v602_v25, 0.0  ;;  %v368_v28 = vpack.c.bf16 %v602_v25, %v602_v25  ;;  %v604_v29 = vpop.eup %603 }
 0x1f8   : > { %356 = vadd.xlane.f32.xlu1 %v355_v27  ;;  %v354_v31 = vmul.f32 %v604_v29, %v353_v30 }
 0x1f9   : > { %568 = vmatmul.mubr.msk.bf16.vlgmr.msra.gmra.mxu1 %vm268_vm0, %v368_v28 }
 0x209   : > { %364 = vperm.xlu1 %600, %v604_v29  }
 0x281   : > { %v357_v32 = vpop.xlane.xlu1 %356 }
 0x282   : > { %v358_v33 = vadd.f32 %v357_v32, %v354_v31 }
 0x284   : > { %360 = vst.msk [vmem:[#allocation3] sm:$0xff] %vm265_vm2, %v358_v33 }
 0x285   : > { %v365_v37 = vpop.permute.xlu1 %364 }
 0x286   : > { %v367_v38 = vmul.f32 %v365_v37, %v361_v36 }
 0x28b   : > { %v423_v34 = vld [vmem:[#allocation3] sm:$0xff] }
 0x28c   : > { %605 = vrcp.f32 %v423_v34 }
 0x299   : > { %v606_v35 = vpop.eup %605 }
 0x29a   : > { %428 = vperm.xlu1 %600, %v606_v35  }
 0x2b9   : > { %v411_v39 = vpop.f32.mrf.mxu1 }
 0x2ba   : > { %v417_v40 = vadd.f32 %v411_v39, %v367_v38 }
 0x2bb   : > { %v569_v41 = vpop.f32.mrf.mxu1 }
 0x2bc   : > { %418 = vst.msk [vmem:[#allocation4] sm:$0xff] %vm268_vm0, %v417_v40 }
 0x2bd   : > { %v414_v42 = vpop.f32.mrf.mxu1 }
 0x2bf   : > { %v570_v43 = vpop.f32.mrf.mxu1 }
 0x2c3   : > { %v425_v44 = vld [vmem:[#allocation4] sm:$0xff] }
 0x315   : > { %v429_v45 = vpop.permute.xlu1 %428 }
 0x316   : > { %v431_v46 = vmul.f32 %v429_v45, %v425_v44 }
 0x318   : > { %v432_v47 = vpack.c.bf16 %v431_v46, %v431_v46 }
 0x31a   : > { %434 = vst.msk [vmem:[%s259_s28] sm:$0xf] %vm433_vm5, %v432_v47 }
 0x31b PF: > { %s13_s14 = sadd.s32 1, %s629_s14   ;;  %s715_s12 = smov %s625_s13 }
 0x31c   : > { %p10_p5 = scmp.ge.s32.totalorder %s13_s14, 10   ;;  %s716_s13 = smov %s718_s15 }
 0x31e   :  { %12 = sbr.rel (!%p10_p5) target bundleno = 2 (0x2), region = 80 }

// kernel: gpt_forward.11
= control target key start
LH: loop header
LB: loop body
LE: loop exit
PB: predicated region body
PF: predicated region fallthrough
CT: control target
= control target key end

     0   :  { %vm32_vm0 = vcmask 261120   ;;  %v208_v15 = vmov 0.0   ;;  %vm209_vm1 = vmmov 0   ;;  %vm25_vm2 = vcmask 785408   ;;  %s273_s0 = inlined_call_operand.vmem [shape: bf16[16,32], index: 0, kind: input, shape index: {}]   ;;  %s274_s3 = inlined_call_operand.vmem [shape: bf16[32,96], index: 3, kind: input, shape index: {}]   ;;  %s275_s1 = inlined_call_operand.vmem [shape: f32[1,32], index: 1, kind: input, shape index: {}]   ;;  %s276_s2 = inlined_call_operand.vmem [shape: f32[1,32], index: 2, kind: input, shape index: {}]   ;;  %s277_s4 = inlined_call_operand.vmem [shape: f32[1,96], index: 4, kind: input, shape index: {}]   ;;  %s278_s5 = inlined_call_operand.vmem [shape: bf16[16,96], index: 5, kind: output, shape index: {}]  }
   0x1   :  { %v186_v0 = vld [vmem:[%s273_s0] sm:$0xff]   ;;  %192 = vmatprep.subr.bf16.mxu0 %v208_v15  ;;  %v202_v16 = vld [vmem:[%s274_s3 + $0x8] sm:$0xff]   ;;  %196 = vmatprep.mubr.msk.bf16.mxu0 %vm209_vm1, %v208_v15  ;;  %26 = vst.msk [vmem:[#allocation2] sm:$0xff] %vm25_vm2, %v208_v15  ;;  %27 = vst.msk [vmem:[#allocation2 + $0x8] sm:$0xff] %vm25_vm2, %v208_v15  ;;  %vm168_vm3 = vcmask 781312  }
   0x2   :  { %v187_v1 = vunpack.c.l.bf16 %v186_v0  ;;  %v188_v2 = vunpack.c.h.bf16 %v186_v0  ;;  %193 = vmatpush3.bf16.msra.mxu0 %v202_v16  ;;  %v203_v17 = vld [vmem:[%s274_s3] sm:$0xff]  }
   0x3   :  { %194 = vmatprep.subr.bf16.mxu0 %v208_v15  ;;  %v175_v26 = vld [vmem:[%s275_s1] ss:$0 sm:$0xff] }
   0x4   :  { %v33_v3 = vsel %vm32_vm0, %v187_v1, 0.0  ;;  %v36_v4 = vsel %vm32_vm0, %v188_v2, 0.0  ;;  %v176_v30 = vld [vmem:[%s276_s2] ss:$0 sm:$0xff] }
   0x5   :  { %34 = vadd.xlane.f32.xlu0 %v33_v3  ;;  %v180_v43 = vld [vmem:[%s277_s4] ss:$0 sm:$0xff] }
   0x6   :  { %195 = vmatpush3.bf16.msra.mxu0 %v203_v17 }
   0x8   :  { %v79_v35 = vld [vmem:[#allocation2] sm:$0xff]  ;;  %v80_v39 = vld [vmem:[#allocation2 + $0x8] sm:$0xff] }
   0x9   :  { %37 = vadd.xlane.f32.xlu0 %v36_v4 }
  0x8e   :  { %v35_v5 = vpop.xlane.xlu0 %34 }
  0x8f   :  { %v40_v6 = vmul.f32 0.03125, %v35_v5 }
  0x91   :  { %v42_v7 = vsub.f32 %v187_v1, %v40_v6 }
  0x92   :  { %v38_v8 = vpop.xlane.xlu0 %37 }
  0x93   :  { %v41_v9 = vmul.f32 0.03125, %v38_v8  ;;  %v44_v10 = vmul.f32 %v42_v7, %v42_v7 }
  0x95   :  { %v43_v11 = vsub.f32 %v188_v2, %v41_v9  ;;  %v46_v12 = vsel %vm32_vm0, %v44_v10, 0.0 }
  0x96   :  { %47 = vadd.xlane.f32.xlu1 %v46_v12 }
  0x97   :  { %v45_v13 = vmul.f32 %v43_v11, %v43_v11 }
  0x99   :  { %v49_v14 = vsel %vm32_vm0, %v45_v13, 0.0 }
  0x9a   :  { %50 = vadd.xlane.f32.xlu1 %v49_v14 }
 0x11f   :  { %v48_v18 = vpop.xlane.xlu1 %47 }
 0x120   :  { %v52_v19 = vmul.f32 0.03125, %v48_v18 }
 0x122   :  { %v54_v20 = vadd.f32 1e-05, %v52_v19 }
 0x123   :  { %v51_v21 = vpop.xlane.xlu1 %50 }
 0x124   :  { %204 = vrsqrt.f32 %v54_v20  ;;  %v53_v22 = vmul.f32 0.03125, %v51_v21 }
 0x126   :  { %v55_v23 = vadd.f32 1e-05, %v53_v22 }
 0x128   :  { %206 = vrsqrt.f32 %v55_v23 }
 0x131   :  { %v205_v24 = vpop.eup %204 }
 0x132   :  { %v58_v25 = vmul.f32 %v205_v24, %v42_v7 }
 0x134   :  { %v67_v29 = vmul.f32 %v175_v26, %v58_v25 }
 0x135   :  { %v207_v27 = vpop.eup %206 }
 0x136   :  { %v59_v28 = vmul.f32 %v207_v27, %v43_v11  ;;  %v76_v32 = vadd.f32 %v176_v30, %v67_v29 }
 0x138   :  { %v68_v31 = vmul.f32 %v175_v26, %v59_v28 }
 0x13a   :  { %v77_v33 = vadd.f32 %v176_v30, %v68_v31 }
 0x13c   :  { %v78_v34 = vpack.c.bf16 %v77_v33, %v76_v32 }
 0x13e   :  { %197 = vmatmul.mubr.msk.bf16.vlgmr.msra.gmra.mxu0 %vm32_vm0, %v78_v34 }
 0x1fe   :  { %v134_v36 = vpop.f32.mrf.mxu0 }
 0x1ff   :  { %v141_v37 = vadd.f32 %v134_v36, %v79_v35 }
 0x200   :  { %v198_v38 = vpop.f32.mrf.mxu0 }
 0x201   :  { %144 = vst.msk [vmem:[#allocation2] sm:$0xff] %vm25_vm2, %v141_v37 }
 0x202   :  { %v137_v40 = vpop.f32.mrf.mxu0 }
 0x203   :  { %v142_v41 = vadd.f32 %v137_v40, %v80_v39 }
 0x204   :  { %v199_v42 = vpop.f32.mrf.mxu0 }
 0x205   :  { %145 = vst.msk [vmem:[#allocation2 + $0x8] sm:$0xff] %vm25_vm2, %v142_v41 }
 0x208   :  { %v149_v44 = vld [vmem:[#allocation2] sm:$0xff] }
 0x209   :  { %v158_v45 = vadd.f32 %v180_v43, %v149_v44 }
 0x20b   :  { %v183_v46 = vpack.c.bf16 %v158_v45, %v158_v45 }
 0x20c   :  { %v150_v47 = vld [vmem:[#allocation2 + $0x8] sm:$0xff] }
 0x20d   :  { %169 = vst.msk [vmem:[%s278_s5] sm:$0xf] %vm168_vm3, %v183_v46  ;;  %v159_v48 = vadd.f32 %v180_v43, %v150_v47 }
 0x20f   :  { %v184_v49 = vpack.c.bf16 %v159_v48, %v159_v48 }
 0x211   :  { %170 = vst.msk [vmem:[%s278_s5 + $0x4] sm:$0xf] %vm168_vm3, %v184_v49 }

// kernel: gpt_forward.13
= control target key start
LH: loop header
LB: loop body
LE: loop exit
PB: predicated region body
PF: predicated region fallthrough
CT: control target
= control target key end

     0   :  { %vm22_vm0 = vcmask 261120   ;;  %v163_v0 = vmov 0.0   ;;  %vm164_vm1 = vmmov 0   ;;  %vm127_vm2 = vcmask 257024   ;;  %s216_s1 = inlined_call_operand.vmem [shape: bf16[32,32], index: 1, kind: input, shape index: {}]   ;;  %s217_s0 = inlined_call_operand.vmem [shape: bf16[16,32], index: 0, kind: input, shape index: {}]   ;;  %s218_s3 = inlined_call_operand.vmem [shape: bf16[16,32], index: 3, kind: input, shape index: {}]   ;;  %s219_s2 = inlined_call_operand.vmem [shape: f32[1,32], index: 2, kind: input, shape index: {}]   ;;  %s220_s4 = inlined_call_operand.vmem [shape: bf16[16,32], index: 4, kind: output, shape index: {}]  }
   0x1   :  { %150 = vmatprep.subr.bf16.mxu0 %v163_v0  ;;  %v160_v1 = vld [vmem:[%s216_s1 + $0x8] sm:$0xff]   ;;  %154 = vmatprep.mubr.msk.bf16.mxu0 %vm164_vm1, %v163_v0  ;;  %23 = vst.msk [vmem:[#allocation2] sm:$0xff] %vm22_vm0, %v163_v0  ;;  %24 = vst.msk [vmem:[#allocation2 + $0x8] sm:$0xff] %vm22_vm0, %v163_v0  ;;  %v161_v2 = vld [vmem:[%s216_s1] sm:$0xff]  }
   0x2   :  { %151 = vmatpush3.bf16.msra.mxu0 %v160_v1  ;;  %v162_v3 = vld [vmem:[%s217_s0] sm:$0xff]  }
   0x3   :  { %152 = vmatprep.subr.bf16.mxu0 %v163_v0  ;;  %v144_v11 = vld [vmem:[%s218_s3] sm:$0xff]  }
   0x4   :  { %v138_v13 = vld [vmem:[%s219_s2] ss:$0 sm:$0xff]  ;;  %v145_v14 = vunpack.c.l.bf16 %v144_v11  ;;  %v146_v18 = vunpack.c.h.bf16 %v144_v11 }
   0x6   :  { %153 = vmatpush3.bf16.msra.mxu0 %v161_v2 }
   0x8   :  { %v27_v4 = vld [vmem:[#allocation2] sm:$0xff]  ;;  %v28_v8 = vld [vmem:[#allocation2 + $0x8] sm:$0xff] }
   0x9   :  { %155 = vmatmul.mubr.msk.bf16.vlgmr.msra.gmra.mxu0 %vm22_vm0, %v162_v3 }
  0xc9   :  { %v88_v5 = vpop.f32.mrf.mxu0 }
  0xca   :  { %v95_v6 = vadd.f32 %v88_v5, %v27_v4 }
  0xcb   :  { %v156_v7 = vpop.f32.mrf.mxu0 }
  0xcc   :  { %97 = vst.msk [vmem:[#allocation2] sm:$0xff] %vm22_vm0, %v95_v6 }
  0xcd   :  { %v91_v9 = vpop.f32.mrf.mxu0 }
  0xce   :  { %v96_v10 = vadd.f32 %v91_v9, %v28_v8 }
  0xcf   :  { %v157_v12 = vpop.f32.mrf.mxu0 }
  0xd0   :  { %98 = vst.msk [vmem:[#allocation2 + $0x8] sm:$0xff] %vm22_vm0, %v96_v10 }
  0xd3   :  { %v102_v15 = vld [vmem:[#allocation2] sm:$0xff] }
  0xd4   :  { %v111_v16 = vadd.f32 %v138_v13, %v102_v15 }
  0xd6   :  { %v117_v17 = vadd.f32 %v145_v14, %v111_v16 }
  0xd7   :  { %v103_v19 = vld [vmem:[#allocation2 + $0x8] sm:$0xff] }
  0xd8   :  { %v141_v20 = vpack.c.bf16 %v117_v17, %v117_v17  ;;  %v112_v21 = vadd.f32 %v138_v13, %v103_v19 }
  0xda   :  { %128 = vst.msk [vmem:[%s220_s4] sm:$0xf] %vm127_vm2, %v141_v20  ;;  %v118_v22 = vadd.f32 %v146_v18, %v112_v21 }
  0xdc   :  { %v142_v23 = vpack.c.bf16 %v118_v22, %v118_v22 }
  0xde   :  { %129 = vst.msk [vmem:[%s220_s4 + $0x4] sm:$0xf] %vm127_vm2, %v142_v23 }

// kernel: gpt_forward.14
= control target key start
LH: loop header
LB: loop body
LE: loop exit
PB: predicated region body
PF: predicated region fallthrough
CT: control target
= control target key end

     0   :  { %vm31_vm0 = vcmask 261120   ;;  %v232_v15 = vmov 0.0   ;;  %vm233_vm1 = vmmov 0   ;;  %s290_s0 = inlined_call_operand.vmem [shape: bf16[16,32], index: 0, kind: input, shape index: {}]   ;;  %s291_s3 = inlined_call_operand.vmem [shape: bf16[32,128], index: 3, kind: input, shape index: {}]   ;;  %s292_s1 = inlined_call_operand.vmem [shape: f32[1,32], index: 1, kind: input, shape index: {}]   ;;  %s293_s2 = inlined_call_operand.vmem [shape: f32[1,32], index: 2, kind: input, shape index: {}]   ;;  %s294_s4 = inlined_call_operand.vmem [shape: f32[1,128], index: 4, kind: input, shape index: {}]   ;;  %s295_s5 = inlined_call_operand.vmem [shape: bf16[16,128], index: 5, kind: output, shape index: {}]  }
   0x1   :  { %v201_v0 = vld [vmem:[%s290_s0] sm:$0xff]   ;;  %212 = vmatprep.subr.bf16.mxu0 %v232_v15  ;;  %v222_v16 = vld [vmem:[%s291_s3 + $0x8] sm:$0xff]   ;;  %216 = vmatprep.mubr.msk.bf16.mxu0 %vm233_vm1, %v232_v15 }
   0x2   :  { %v202_v1 = vunpack.c.l.bf16 %v201_v0  ;;  %v203_v2 = vunpack.c.h.bf16 %v201_v0  ;;  %213 = vmatpush3.bf16.msra.mxu0 %v222_v16  ;;  %v223_v17 = vld [vmem:[%s291_s3] sm:$0xff]  }
   0x3   :  { %214 = vmatprep.subr.bf16.mxu0 %v232_v15  ;;  %v190_v26 = vld [vmem:[%s292_s1] ss:$0 sm:$0xff] }
   0x4   :  { %v32_v3 = vsel %vm31_vm0, %v202_v1, 0.0  ;;  %v35_v4 = vsel %vm31_vm0, %v203_v2, 0.0  ;;  %v191_v30 = vld [vmem:[%s293_s2] ss:$0 sm:$0xff] }
   0x5   :  { %33 = vadd.xlane.f32.xlu0 %v32_v3  ;;  %v195_v35 = vld [vmem:[%s294_s4] ss:$0 sm:$0xff] }
   0x6   :  { %215 = vmatpush3.bf16.msra.mxu0 %v223_v17 }
   0x9   :  { %36 = vadd.xlane.f32.xlu0 %v35_v4 }
  0x8e   :  { %v34_v5 = vpop.xlane.xlu0 %33 }
  0x8f   :  { %v39_v6 = vmul.f32 0.03125, %v34_v5 }
  0x91   :  { %v41_v7 = vsub.f32 %v202_v1, %v39_v6 }
  0x92   :  { %v37_v8 = vpop.xlane.xlu0 %36 }
  0x93   :  { %v40_v9 = vmul.f32 0.03125, %v37_v8  ;;  %v43_v10 = vmul.f32 %v41_v7, %v41_v7 }
  0x95   :  { %v42_v11 = vsub.f32 %v203_v2, %v40_v9  ;;  %v45_v12 = vsel %vm31_vm0, %v43_v10, 0.0 }
  0x96   :  { %46 = vadd.xlane.f32.xlu1 %v45_v12 }
  0x97   :  { %v44_v13 = vmul.f32 %v42_v11, %v42_v11 }
  0x99   :  { %v48_v14 = vsel %vm31_vm0, %v44_v13, 0.0 }
  0x9a   :  { %49 = vadd.xlane.f32.xlu1 %v48_v14 }
 0x11f   :  { %v47_v18 = vpop.xlane.xlu1 %46 }
 0x120   :  { %v51_v19 = vmul.f32 0.03125, %v47_v18 }
 0x122   :  { %v53_v20 = vadd.f32 1e-05, %v51_v19 }
 0x123   :  { %v50_v21 = vpop.xlane.xlu1 %49 }
 0x124   :  { %224 = vrsqrt.f32 %v53_v20  ;;  %v52_v22 = vmul.f32 0.03125, %v50_v21 }
 0x126   :  { %v54_v23 = vadd.f32 1e-05, %v52_v22 }
 0x128   :  { %226 = vrsqrt.f32 %v54_v23 }
 0x131   :  { %v225_v24 = vpop.eup %224 }
 0x132   :  { %v57_v25 = vmul.f32 %v225_v24, %v41_v7 }
 0x134   :  { %v66_v29 = vmul.f32 %v190_v26, %v57_v25 }
 0x135   :  { %v227_v27 = vpop.eup %226 }
 0x136   :  { %v58_v28 = vmul.f32 %v227_v27, %v42_v11  ;;  %v75_v32 = vadd.f32 %v191_v30, %v66_v29 }
 0x138   :  { %v67_v31 = vmul.f32 %v190_v26, %v58_v28 }
 0x13a   :  { %v76_v33 = vadd.f32 %v191_v30, %v67_v31 }
 0x13c   :  { %v77_v34 = vpack.c.bf16 %v76_v33, %v75_v32 }
 0x13e   :  { %217 = vmatmul.mubr.msk.bf16.vlgmr.msra.gmra.mxu0 %vm31_vm0, %v77_v34 }
 0x1fe   :  { %v133_v36 = vpop.f32.mrf.mxu0 }
 0x1ff   :  { %v156_v37 = vadd.f32 %v195_v35, %v133_v36 }
 0x200   :  { %v218_v38 = vpop.f32.mrf.mxu0 }
 0x201   :  { %v160_v39 = vmul.f32 0.044715, %v156_v37  ;;  %v158_v55 = vmul.f32 0.5, %v156_v37 }
 0x202   :  { %v136_v40 = vpop.f32.mrf.mxu0 }
 0x203   :  { %v162_v41 = vmul.f32 %v160_v39, %v156_v37  ;;  %v157_v42 = vadd.f32 %v195_v35, %v136_v40 }
 0x204   :  { %v219_v43 = vpop.f32.mrf.mxu0 }
 0x205   :  { %v164_v44 = vmul.f32 %v162_v41, %v156_v37  ;;  %v161_v45 = vmul.f32 0.044715, %v157_v42  ;;  %v159_v56 = vmul.f32 0.5, %v157_v42 }
 0x207   :  { %v166_v46 = vadd.f32 %v164_v44, %v156_v37  ;;  %v163_v47 = vmul.f32 %v161_v45, %v157_v42 }
 0x209   :  { %v168_v48 = vmul.f32 0.7978846, %v166_v46  ;;  %v165_v49 = vmul.f32 %v163_v47, %v157_v42 }
 0x20b   :  { %228 = vtanh.f32 %v168_v48  ;;  %v167_v50 = vadd.f32 %v165_v49, %v157_v42 }
 0x20d   :  { %v169_v51 = vmul.f32 0.7978846, %v167_v50 }
 0x20f   :  { %230 = vtanh.f32 %v169_v51 }
 0x218   :  { %v229_v52 = vpop.eup %228 }
 0x219   :  { %v172_v53 = vadd.f32 1.0, %v229_v52 }
 0x21b   :  { %v174_v58 = vmul.f32 %v172_v53, %v158_v55 }
 0x21c   :  { %v231_v54 = vpop.eup %230 }
 0x21d   :  { %v173_v57 = vadd.f32 1.0, %v231_v54 }
 0x21f   :  { %v175_v59 = vmul.f32 %v173_v57, %v159_v56 }
 0x221   :  { %v207_v60 = vpack.c.bf16 %v175_v59, %v174_v58 }
 0x223   :  { %208 = vst [vmem:[%s295_s5] sm:$0xff] %v207_v60  }

// kernel: gpt_forward.15
= control target key start
LH: loop header
LB: loop body
LE: loop exit
PB: predicated region body
PF: predicated region fallthrough
CT: control target
= control target key end

     0   :  { %vm22_vm0 = vcmask 261120   ;;  %v238_v0 = vmov 0.0   ;;  %vm239_vm1 = vmmov 0   ;;  %vm173_vm2 = vcmask 257024   ;;  %s308_s1 = inlined_call_operand.vmem [shape: bf16[128,32], index: 1, kind: input, shape index: {}]   ;;  %s309_s0 = inlined_call_operand.vmem [shape: bf16[16,128], index: 0, kind: input, shape index: {}]   ;;  %s310_s3 = inlined_call_operand.vmem [shape: bf16[16,32], index: 3, kind: input, shape index: {}]   ;;  %s311_s2 = inlined_call_operand.vmem [shape: f32[1,32], index: 2, kind: input, shape index: {}]   ;;  %s312_s4 = inlined_call_operand.vmem [shape: bf16[16,32], index: 4, kind: output, shape index: {}]  }
   0x1   :  { %207 = vmatprep.subr.bf16.mxu0 %v238_v0  ;;  %v229_v1 = vld [vmem:[%s308_s1 + $0x38] sm:$0xff]   ;;  %223 = vmatprep.mubr.msk.bf16.mxu0 %vm239_vm1, %v238_v0  ;;  %23 = vst.msk [vmem:[#allocation2] sm:$0xff] %vm22_vm0, %v238_v0  ;;  %24 = vst.msk [vmem:[#allocation2 + $0x8] sm:$0xff] %vm22_vm0, %v238_v0  ;;  %v230_v2 = vld [vmem:[%s308_s1 + $0x30] sm:$0xff]  }
   0x2   :  { %208 = vmatpush3.bf16.msra.mxu0 %v229_v1  ;;  %v231_v3 = vld [vmem:[%s308_s1 + $0x28] sm:$0xff]   ;;  %v232_v4 = vld [vmem:[%s308_s1 + $0x20] sm:$0xff]   ;;  %v233_v5 = vld [vmem:[%s308_s1 + $0x18] sm:$0xff]  }
   0x3   :  { %209 = vmatprep.subr.bf16.mxu0 %v238_v0  ;;  %v234_v6 = vld [vmem:[%s308_s1 + $0x10] sm:$0xff]   ;;  %v235_v7 = vld [vmem:[%s308_s1 + $0x8] sm:$0xff]   ;;  %v236_v8 = vld [vmem:[%s308_s1] sm:$0xff]  }
   0x4   :  { %v237_v9 = vld [vmem:[%s309_s0] sm:$0xff]  }
   0x5   :  { %v195_v17 = vld [vmem:[%s310_s3] sm:$0xff]  }
   0x6   :  { %210 = vmatpush3.bf16.msra.mxu0 %v230_v2  ;;  %v189_v19 = vld [vmem:[%s311_s2] ss:$0 sm:$0xff]  ;;  %v196_v20 = vunpack.c.l.bf16 %v195_v17  ;;  %v197_v24 = vunpack.c.h.bf16 %v195_v17 }
   0x7   :  { %211 = vmatprep.subr.bf16.mxu0 %v238_v0 }
   0x8   :  { %v27_v10 = vld [vmem:[#allocation2] sm:$0xff]  ;;  %v28_v14 = vld [vmem:[#allocation2 + $0x8] sm:$0xff] }
   0xa   :  { %212 = vmatpush3.bf16.msra.mxu0 %v231_v3 }
   0xb   :  { %213 = vmatprep.subr.bf16.mxu0 %v238_v0 }
   0xe   :  { %214 = vmatpush3.bf16.msra.mxu0 %v232_v4 }
   0xf   :  { %215 = vmatprep.subr.bf16.mxu0 %v238_v0 }
  0x12   :  { %216 = vmatpush3.bf16.msra.mxu0 %v233_v5 }
  0x13   :  { %217 = vmatprep.subr.bf16.mxu0 %v238_v0 }
  0x16   :  { %218 = vmatpush3.bf16.msra.mxu0 %v234_v6 }
  0x17   :  { %219 = vmatprep.subr.bf16.mxu0 %v238_v0 }
  0x1a   :  { %220 = vmatpush3.bf16.msra.mxu0 %v235_v7 }
  0x1b   :  { %221 = vmatprep.subr.bf16.mxu0 %v238_v0 }
  0x1e   :  { %222 = vmatpush3.bf16.msra.mxu0 %v236_v8 }
  0x21   :  { %224 = vmatmul.mubr.bf16.vlgmr.msra.gmra.mxu0 %v237_v9 }
  0xe1   :  { %v133_v11 = vpop.f32.mrf.mxu0 }
  0xe2   :  { %v140_v12 = vadd.f32 %v133_v11, %v27_v10 }
  0xe3   :  { %v225_v13 = vpop.f32.mrf.mxu0 }
  0xe4   :  { %143 = vst.msk [vmem:[#allocation2] sm:$0xff] %vm22_vm0, %v140_v12 }
  0xe5   :  { %v136_v15 = vpop.f32.mrf.mxu0 }
  0xe6   :  { %v141_v16 = vadd.f32 %v136_v15, %v28_v14 }
  0xe7   :  { %v226_v18 = vpop.f32.mrf.mxu0 }
  0xe8   :  { %144 = vst.msk [vmem:[#allocation2 + $0x8] sm:$0xff] %vm22_vm0, %v141_v16 }
  0xeb   :  { %v148_v21 = vld [vmem:[#allocation2] sm:$0xff] }
  0xec   :  { %v157_v22 = vadd.f32 %v189_v19, %v148_v21 }
  0xee   :  { %v163_v23 = vadd.f32 %v196_v20, %v157_v22 }
  0xef   :  { %v149_v25 = vld [vmem:[#allocation2 + $0x8] sm:$0xff] }
  0xf0   :  { %v192_v26 = vpack.c.bf16 %v163_v23, %v163_v23  ;;  %v158_v27 = vadd.f32 %v189_v19, %v149_v25 }
  0xf2   :  { %174 = vst.msk [vmem:[%s312_s4] sm:$0xf] %vm173_vm2, %v192_v26  ;;  %v164_v28 = vadd.f32 %v197_v24, %v158_v27 }
  0xf4   :  { %v193_v29 = vpack.c.bf16 %v164_v28, %v164_v28 }
  0xf6   :  { %175 = vst.msk [vmem:[%s312_s4 + $0x4] sm:$0xf] %vm173_vm2, %v193_v29 }

// kernel: gpt_forward.21
= control target key start
LH: loop header
LB: loop body
LE: loop exit
PB: predicated region body
PF: predicated region fallthrough
CT: control target
= control target key end

     0   :  { %vm29_vm0 = vcmask 261120   ;;  %s271_s0 = inlined_call_operand.vmem [shape: bf16[16,32], index: 0, kind: input, shape index: {}]   ;;  %s272_s1 = inlined_call_operand.vmem [shape: f32[1,32], index: 1, kind: input, shape index: {}]   ;;  %s273_s2 = inlined_call_operand.vmem [shape: f32[1,32], index: 2, kind: input, shape index: {}]   ;;  %s274_s3 = inlined_call_operand.vmem [shape: bf16[32,128], index: 3, kind: input, shape index: {}]   ;;  %s275_s4 = inlined_call_operand.hbm [shape: f32[16,128], index: 4, kind: output, shape index: {}]  }
   0x1   :  { %v171_v0 = vld [vmem:[%s271_s0] sm:$0xff]  }
   0x2   :  { %v172_v1 = vunpack.c.l.bf16 %v171_v0  ;;  %v173_v2 = vunpack.c.h.bf16 %v171_v0 }
   0x3   :  { %9 = vsyncpa [#allocation4], 0  ;;  %v190_v15 = vld [vmem:[%s274_s3 + $0x8] sm:$0xff]   ;;  %v218_v16 = vmov 0.0   ;;  %vm219_vm1 = vmmov 0   ;;  %v191_v17 = vld [vmem:[%s274_s3] sm:$0xff]  }
   0x4   :  { %v30_v3 = vsel %vm29_vm0, %v172_v1, 0.0  ;;  %v33_v4 = vsel %vm29_vm0, %v173_v2, 0.0  ;;  %177 = vmatprep.subr.bf16.mxu0 %v218_v16  ;;  %181 = vmatprep.mubr.msk.bf16.mxu0 %vm219_vm1, %v218_v16  ;;  %v165_v26 = vld [vmem:[%s272_s1] ss:$0 sm:$0xff]  ;;  %s220_s23 = smov [#allocation3]  }
   0x5   :  { %31 = vadd.xlane.f32.xlu0 %v30_v3  ;;  %178 = vmatpush3.bf16.msra.mxu0 %v190_v15  ;;  %v166_v30 = vld [vmem:[%s273_s2] ss:$0 sm:$0xff]  ;;  %s154_s24 = sshll.u32 %s220_s23, 4  ;;  %s155_s24 = int_to_ptr.vmem [resolvable:$true] %s154_s24 }
   0x6   :  { %179 = vmatprep.subr.bf16.mxu0 %v218_v16  ;;  %s196_s1 = scalar_lea.vmem %s155_s24, 256  ;;  %p201_p1 = scmp.lt.s32.totalorder %s155_s24, %s155_s24 }
   0x7   :  { %p197_p0 = scmp.ne.s32.totalorder %s155_s24, %s196_s1  ;;  %p202_p2 = scmp.lt.s32.totalorder %s196_s1, %s196_s1 }
   0x9   :  { %34 = vadd.xlane.f32.xlu0 %v33_v4  ;;  %180 = vmatpush3.bf16.msra.mxu0 %v191_v17  ;;  %p203_p3 = por %p202_p2, %p201_p1 }
   0xb   :  { %p204_p4 = pnand %p203_p3, %p197_p0 }
  0x8e   :  { %v32_v5 = vpop.xlane.xlu0 %31 }
  0x8f   :  { %v37_v6 = vmul.f32 0.03125, %v32_v5 }
  0x91   :  { %v39_v7 = vsub.f32 %v172_v1, %v37_v6 }
  0x92   :  { %v35_v8 = vpop.xlane.xlu0 %34 }
  0x93   :  { %v38_v9 = vmul.f32 0.03125, %v35_v8  ;;  %v41_v10 = vmul.f32 %v39_v7, %v39_v7 }
  0x95   :  { %v40_v11 = vsub.f32 %v173_v2, %v38_v9  ;;  %v43_v12 = vsel %vm29_vm0, %v41_v10, 0.0 }
  0x96   :  { %44 = vadd.xlane.f32.xlu1 %v43_v12 }
  0x97   :  { %v42_v13 = vmul.f32 %v40_v11, %v40_v11 }
  0x99   :  { %v46_v14 = vsel %vm29_vm0, %v42_v13, 0.0 }
  0x9a   :  { %47 = vadd.xlane.f32.xlu1 %v46_v14 }
 0x11f   :  { %v45_v18 = vpop.xlane.xlu1 %44 }
 0x120   :  { %v49_v19 = vmul.f32 0.03125, %v45_v18 }
 0x122   :  { %v51_v20 = vadd.f32 1e-05, %v49_v19 }
 0x123   :  { %v48_v21 = vpop.xlane.xlu1 %47 }
 0x124   :  { %192 = vrsqrt.f32 %v51_v20  ;;  %v50_v22 = vmul.f32 0.03125, %v48_v21 }
 0x126   :  { %v52_v23 = vadd.f32 1e-05, %v50_v22 }
 0x128   :  { %194 = vrsqrt.f32 %v52_v23 }
 0x131   :  { %v193_v24 = vpop.eup %192 }
 0x132   :  { %v55_v25 = vmul.f32 %v193_v24, %v39_v7 }
 0x134   :  { %v64_v29 = vmul.f32 %v165_v26, %v55_v25 }
 0x135   :  { %v195_v27 = vpop.eup %194 }
 0x136   :  { %v56_v28 = vmul.f32 %v195_v27, %v40_v11  ;;  %v73_v32 = vadd.f32 %v166_v30, %v64_v29 }
 0x138   :  { %v65_v31 = vmul.f32 %v165_v26, %v56_v28 }
 0x13a   :  { %v74_v33 = vadd.f32 %v166_v30, %v65_v31 }
 0x13c   :  { %v75_v34 = vpack.c.bf16 %v74_v33, %v73_v32 }
 0x13e   :  { %182 = vmatmul.mubr.msk.bf16.vlgmr.msra.gmra.mxu0 %vm29_vm0, %v75_v34 }
 0x1fe   :  { %v131_v35 = vpop.f32.mrf.mxu0 }
 0x1ff   :  { %147 = vst [vmem:[#allocation3] sm:$0xff] %v131_v35 }
 0x200   :  { %v183_v36 = vpop.f32.mrf.mxu0 }
 0x202   :  { %v134_v37 = vpop.f32.mrf.mxu0 }
 0x203   :  { %148 = vst [vmem:[#allocation3 + $0x8] sm:$0xff] %v134_v37 }
 0x204   :  { %v184_v38 = vpop.f32.mrf.mxu0 }
 0x205   :  { %207 = shalt.err (!%p204_p4)
}
 0x206   :  { %s221_s2 = smov 128   ;;  %s222_s25 = smov 8  }
 0x207   :  { %160 = dma.vmem_to_hbm [thread:$0]  %s155_s24, 256, %s275_s4, [#allocation4], %s221_s2, %s221_s2, %s222_s25  }
 0x208   :  { %216 = dma.done.wait [#allocation4], 256  }
 0x209   :  { %217 = vsyncadd [#allocation4], 4294967040 }
 0x20a   :  { %164 = vsyncpa [#allocation4], 1 }

</bundles_post_ra>
